<compile_context>
chip_gen: v5e
topology: v5e:2x2
jax: 0.10.0
libtpu: 0.0.40
codegen_flags: <defaults>
</compile_context>

<pallas_src>
import math

import jax
import jax.numpy as jnp
from jax.experimental import pallas as pl
from jax.experimental.pallas import tpu as pltpu

# ---------------- tiny synthetic config ----------------
SR        = 16000                 # == feature-extractor sampling rate -> Resample is identity
N_FFT     = 32
HOP       = 16
N_SAMPLES = 256                   # max padded audio length
N_MELS    = 8
N_BINS    = N_FFT // 2 + 1        # 17 (onesided)
N_FRAMES  = N_SAMPLES // HOP      # 16 mel frames (stft[..., :-1])
D_MODEL   = 32
N_HEADS   = 4
HEAD_DIM  = D_MODEL // N_HEADS
FFN_DIM   = 64
N_LAYERS  = 2
MAX_POS   = N_FRAMES // 2         # 8 = encoder sequence length

_INV_LN10 = 1.0 / math.log(10.0)


# ---------------- in-kernel helpers ----------------
def _gelu(x):
    # exact (erf-based) GELU, matching torch.nn.functional.gelu default
    return 0.5 * x * (1.0 + jax.lax.erf(x * (1.0 / math.sqrt(2.0))))


def _layernorm(x, g, b, eps=1e-5):
    mu = jnp.mean(x, axis=-1, keepdims=True)
    var = jnp.mean(jnp.square(x - mu), axis=-1, keepdims=True)
    return (x - mu) * jax.lax.rsqrt(var + eps) * g + b


def _bf16(x):
    return x.astype(jnp.bfloat16)


# ---------------- single fused per-sample kernel ----------------
def _whisper_kernel(frames_ref,                       # (1, N_FRAMES, N_FFT) f32
                    wdft_ref,                         # (N_FFT, 2*N_BINS) bf16 (window folded in)
                    fbank_t_ref,                      # (N_BINS, N_MELS)   bf16
                    c1w_ref, c1b_ref,                 # (N_MELS, 3*D) bf16, (1, D) f32
                    sel2_ref,                         # (3, MAX_POS, N_FRAMES) bf16
                    c2w_ref, c2b_ref,                 # (D, 3*D) bf16, (1, D) f32
                    pos_ref,                          # (MAX_POS, D) f32
                    ln1g_ref, ln1b_ref,               # (L, 1, D) f32
                    wq_ref, bq_ref, wk_ref, wv_ref, bv_ref, wo_ref, bo_ref,
                    ln2g_ref, ln2b_ref,
                    w1_ref, b1_ref, w2_ref, b2_ref,   # (L,D,F)bf16/(L,1,F)f32/(L,F,D)bf16/(L,1,D)f32
                    lnfg_ref, lnfb_ref,               # (1, D) f32
                    o_ref):                           # (1, MAX_POS, D) f32
    L = wq_ref.shape[0]
    x = frames_ref[0]                                                    # (N_FRAMES, N_FFT)

    # ---------- log-mel: fused windowed DFT (cos|sin) -> power -> mel -> log10 ----------
    dft = jnp.dot(_bf16(x), wdft_ref[...], preferred_element_type=jnp.float32)  # (N_FRAMES, 2*N_BINS)
    re = dft[:, :N_BINS]
    im = dft[:, N_BINS:]
    power = re * re + im * im                                            # |stft|^2
    mel = jnp.dot(_bf16(power), fbank_t_ref[...],
                  preferred_element_type=jnp.float32)                    # (N_FRAMES, N_MELS)
    logmel = jnp.log(jnp.maximum(mel, 1e-10)) * _INV_LN10

    # per-sample dynamic-range clamp (lane-reduce, then sublane-reduce)
    row_max = jnp.max(logmel, axis=-1, keepdims=True)                    # (N_FRAMES, 1)
    gmax = jnp.max(row_max)
    logmel = jnp.maximum(logmel, gmax - 8.0)
    x0 = (logmel + 4.0) * 0.25                                           # (N_FRAMES, N_MELS)

    t_idx = jax.lax.broadcasted_iota(jnp.int32, (N_FRAMES, 1), 0)

    # ---------- conv1d (K=3, stride 1, pad 1) + GELU: one fused matmul + sublane rolls ----------
    u1 = jnp.dot(_bf16(x0), c1w_ref[...], preferred_element_type=jnp.float32)   # (N_FRAMES, 3*D)
    y1 = u1[:, D_MODEL:2 * D_MODEL]                                      # k=1 (center tap)
    # k=0 tap uses x[t-1]: roll down by 1, zero row 0
    prev = pltpu.roll(u1[:, :D_MODEL], shift=1, axis=0)
    y1 = y1 + jnp.where(t_idx > 0, prev, 0.0)
    # k=2 tap uses x[t+1]: roll up by 1 (== down by N-1), zero last row
    nxt = pltpu.roll(u1[:, 2 * D_MODEL:], shift=N_FRAMES - 1, axis=0)
    y1 = y1 + jnp.where(t_idx < N_FRAMES - 1, nxt, 0.0)
    h1 = _gelu(y1 + c1b_ref[...])                                        # (N_FRAMES, D)

    # ---------- conv1d (K=3, stride 2, pad 1) + GELU + pos-emb ----------
    u2 = jnp.dot(_bf16(h1), c2w_ref[...], preferred_element_type=jnp.float32)   # (N_FRAMES, 3*D)
    y2 = jnp.dot(sel2_ref[0], _bf16(u2[:, :D_MODEL]),
                 preferred_element_type=jnp.float32)
    y2 = y2 + jnp.dot(sel2_ref[1], _bf16(u2[:, D_MODEL:2 * D_MODEL]),
                      preferred_element_type=jnp.float32)
    y2 = y2 + jnp.dot(sel2_ref[2], _bf16(u2[:, 2 * D_MODEL:]),
                      preferred_element_type=jnp.float32)
    h = _gelu(y2 + c2b_ref[...]) + pos_ref[...]                          # (MAX_POS, D)

    # ---------- transformer encoder layers (pre-norm), unrolled ----------
    scale = HEAD_DIM ** -0.5
    for l in range(L):
        res = h
        hn = _layernorm(h, ln1g_ref[l], ln1b_ref[l])
        hb = _bf16(hn)
        q = (jnp.dot(hb, wq_ref[l], preferred_element_type=jnp.float32) + bq_ref[l]) * scale
        kk = jnp.dot(hb, wk_ref[l], preferred_element_type=jnp.float32)         # k_proj: no bias
        v = jnp.dot(hb, wv_ref[l], preferred_element_type=jnp.float32) + bv_ref[l]

        ctxs = []
        for hh in range(N_HEADS):
            sl = slice(hh * HEAD_DIM, (hh + 1) * HEAD_DIM)
            qh, kh, vh = _bf16(q[:, sl]), _bf16(kk[:, sl]), _bf16(v[:, sl])
            sc = jax.lax.dot_general(qh, kh, (((1,), (1,)), ((), ())),
                                     preferred_element_type=jnp.float32)        # (S, S) f32
            m = jnp.max(sc, axis=-1, keepdims=True)
            e = jnp.exp(sc - m)
            p = e * pl.reciprocal(jnp.sum(e, axis=-1, keepdims=True), approx=True)
            ctxs.append(jnp.dot(_bf16(p), vh, preferred_element_type=jnp.float32))
        ctx = jnp.concatenate(ctxs, axis=-1)                                     # (S, D)
        attn = jnp.dot(_bf16(ctx), wo_ref[l], preferred_element_type=jnp.float32) + bo_ref[l]
        h = res + attn

        res = h
        hn = _layernorm(h, ln2g_ref[l], ln2b_ref[l])
        hn = _gelu(jnp.dot(_bf16(hn), w1_ref[l], preferred_element_type=jnp.float32) + b1_ref[l])
        hn = jnp.dot(_bf16(hn), w2_ref[l], preferred_element_type=jnp.float32) + b2_ref[l]
        h = res + hn

    # ---------- final layer norm ----------
    o_ref[0] = _layernorm(h, lnfg_ref[...], lnfb_ref[...])


# ---------------- deterministic synthetic parameters (PyTorch-like layout) ----------------
def init_params(key):
    keys = jax.random.split(key, 64)
    it = iter(keys)

    def nrm(shape, scale=0.02):
        return scale * jax.random.normal(next(it), shape, jnp.float32)

    params = {
        "fbank": jnp.abs(nrm((N_MELS, N_BINS), 1.0)) * 0.1,       # synthetic mel filterbank
        "conv1_w": nrm((D_MODEL, N_MELS, 3)),  "conv1_b": nrm((D_MODEL,)),
        "conv2_w": nrm((D_MODEL, D_MODEL, 3)), "conv2_b": nrm((D_MODEL,)),
        "pos_emb": nrm((MAX_POS, D_MODEL)),
        "lnf_g": jnp.ones((1, D_MODEL), jnp.float32),
        "lnf_b": jnp.zeros((1, D_MODEL), jnp.float32),
    }
    layers = []
    for _ in range(N_LAYERS):
        layers.append({
            "ln1_g": jnp.ones((1, D_MODEL), jnp.float32),
            "ln1_b": jnp.zeros((1, D_MODEL), jnp.float32),
            "wq": nrm((D_MODEL, D_MODEL)), "bq": nrm((1, D_MODEL)),
            "wk": nrm((D_MODEL, D_MODEL)),                      # k_proj has no bias in Whisper
            "wv": nrm((D_MODEL, D_MODEL)), "bv": nrm((1, D_MODEL)),
            "wo": nrm((D_MODEL, D_MODEL)), "bo": nrm((1, D_MODEL)),
            "ln2_g": jnp.ones((1, D_MODEL), jnp.float32),
            "ln2_b": jnp.zeros((1, D_MODEL), jnp.float32),
            "w1": nrm((D_MODEL, FFN_DIM)), "b1": nrm((1, FFN_DIM)),
            "w2": nrm((FFN_DIM, D_MODEL)), "b2": nrm((1, D_MODEL)),
        })
    params["layers"] = layers
    return params


# ---------------- one-time parameter prep (hoisted out of the hot path) ----------------
def prepare_params(p):
    n = jnp.arange(N_FFT, dtype=jnp.float32)
    kb = jnp.arange(N_BINS, dtype=jnp.float32)
    ang = 2.0 * math.pi * n[:, None] * kb[None, :] / N_FFT
    window = 0.5 * (1.0 - jnp.cos(2.0 * math.pi * n / N_FFT))   # periodic hann
    wcos = window[:, None] * jnp.cos(ang)
    wsin = -(window[:, None] * jnp.sin(ang))
    wdft = jnp.concatenate([wcos, wsin], axis=1)                # (N_FFT, 2*N_BINS), fused DFT

    # static stride-2 selection matrices: sel2[k][s, t] = 1 iff t == 2s + k - 1
    s = jnp.arange(MAX_POS)[:, None]
    t = jnp.arange(N_FRAMES)[None, :]
    sel2 = jnp.stack([(t == 2 * s + (k - 1)).astype(jnp.float32) for k in range(3)], axis=0)

    def cat_conv(w):    # (C_out, C_in, K) -> (C_in, K*C_out), tap-major column blocks
        return jnp.concatenate([w[:, :, k].T for k in range(3)], axis=1)

    bf = lambda a: a.astype(jnp.bfloat16)
    prep = {
        "wdft": bf(wdft),
        "fbank_t": bf(p["fbank"].T),                            # (n_bins, n_mels)
        "c1w": bf(cat_conv(p["conv1_w"])),                      # (N_MELS, 3*D)
        "c1b": p["conv1_b"].reshape(1, D_MODEL),
        "sel2": bf(sel2),                                       # exact 0/1 in bf16
        "c2w": bf(cat_conv(p["conv2_w"])),                      # (D, 3*D)
        "c2b": p["conv2_b"].reshape(1, D_MODEL),
        "pos_emb": p["pos_emb"],
        "lnf_g": p["lnf_g"], "lnf_b": p["lnf_b"],
    }
    bf16_names = {"wq", "wk", "wv", "wo", "w1", "w2"}           # MXU operands -> bf16
    for name in ["ln1_g", "ln1_b", "wq", "bq", "wk", "wv", "bv", "wo", "bo",
                 "ln2_g", "ln2_b", "w1", "b1", "w2", "b2"]:
        stacked = jnp.stack([lp[name] for lp in p["layers"]], axis=0)
        prep[name] = bf(stacked) if name in bf16_names else stacked
    return prep


# ---------------- full forward: one fused pallas_call, batch grid ----------------
def whisper_forward(audio, prep):
    """audio: [B, T] float32 in [-1, 1].  Returns [B, D_MODEL, T // HOP]."""
    B, T = audio.shape
    assert T <= N_SAMPLES, f"audio length should be shorter than {N_SAMPLES}"
    # TODO(synk): torchaudio Resample is identity here (sr == feature-extractor rate);
    # a sinc-interpolation resampler is not implemented.
    audio = jnp.pad(audio, ((0, 0), (0, N_SAMPLES - T)))

    # STFT framing (center=True, reflect padding); everything else happens in-kernel.
    padded = jnp.pad(audio, ((0, 0), (N_FFT // 2, N_FFT // 2)), mode="reflect")
    idx = jnp.arange(N_FRAMES)[:, None] * HOP + jnp.arange(N_FFT)[None, :]
    frames = padded[:, idx]                                     # (B, N_FRAMES, N_FFT)

    weight_args = (
        prep["wdft"], prep["fbank_t"],
        prep["c1w"], prep["c1b"], prep["sel2"], prep["c2w"], prep["c2b"], prep["pos_emb"],
        prep["ln1_g"], prep["ln1_b"],
        prep["wq"], prep["bq"], prep["wk"], prep["wv"], prep["bv"], prep["wo"], prep["bo"],
        prep["ln2_g"], prep["ln2_b"],
        prep["w1"], prep["b1"], prep["w2"], prep["b2"],
        prep["lnf_g"], prep["lnf_b"],
    )

    def const_spec(arr):   # full-array block, constant index_map (fetched once, VMEM-resident)
        return pl.BlockSpec(arr.shape, lambda b, _n=arr.ndim: (0,) * _n)

    in_specs = [pl.BlockSpec((1, N_FRAMES, N_FFT), lambda b: (b, 0, 0))]
    in_specs += [const_spec(w) for w in weight_args]

    out = pl.pallas_call(
        _whisper_kernel,
        grid=(B,),                                              # one sample per grid step
        in_specs=in_specs,
        out_specs=pl.BlockSpec((1, MAX_POS, D_MODEL), lambda b: (b, 0, 0)),
        out_shape=jax.ShapeDtypeStruct((B, MAX_POS, D_MODEL), jnp.float32),
        compiler_params=pltpu.CompilerParams(
            dimension_semantics=("parallel",),                  # megacore-shard batch on v7x
            vmem_limit_bytes=32 * 1024 * 1024),
    )(frames, *weight_args)

    t_out = min(T // HOP, MAX_POS)                              # outputs[:, :timesteps // hop]
    return jnp.transpose(out[:, :t_out], (0, 2, 1))             # [B, D_MODEL, t_out]


if __name__ == "__main__":
    key = jax.random.PRNGKey(0)
    pkey, akey = jax.random.split(key)
    params = init_params(pkey)
    prep = prepare_params(params)                               # one-time repacking

    B, T = 2, 96                                                # T <= N_SAMPLES
    audio = jax.random.uniform(akey, (B, T), jnp.float32, -1.0, 1.0)

    out = jax.jit(whisper_forward)(audio, prep)
    out = jax.block_until_ready(out)
    assert out.shape == (B, D_MODEL, T // HOP), out.shape
    assert bool(jnp.all(jnp.isfinite(out)))
    print("KERNEL_OK")
</pallas_src>

<mosaic_0001>
module attributes {stable_mosaic.version = 11 : i64} {
  func.func @_whisper_kernel(%arg0: i32, %arg1: memref<1x16x32xf32, #tpu.memory_space<vmem>>, %arg2: memref<32x34xbf16, #tpu.memory_space<vmem>>, %arg3: memref<17x8xbf16, #tpu.memory_space<vmem>>, %arg4: memref<8x96xbf16, #tpu.memory_space<vmem>>, %arg5: memref<1x32xf32, #tpu.memory_space<vmem>>, %arg6: memref<3x8x16xbf16, #tpu.memory_space<vmem>>, %arg7: memref<32x96xbf16, #tpu.memory_space<vmem>>, %arg8: memref<1x32xf32, #tpu.memory_space<vmem>>, %arg9: memref<8x32xf32, #tpu.memory_space<vmem>>, %arg10: memref<2x1x32xf32, #tpu.memory_space<vmem>>, %arg11: memref<2x1x32xf32, #tpu.memory_space<vmem>>, %arg12: memref<2x32x32xbf16, #tpu.memory_space<vmem>>, %arg13: memref<2x1x32xf32, #tpu.memory_space<vmem>>, %arg14: memref<2x32x32xbf16, #tpu.memory_space<vmem>>, %arg15: memref<2x32x32xbf16, #tpu.memory_space<vmem>>, %arg16: memref<2x1x32xf32, #tpu.memory_space<vmem>>, %arg17: memref<2x32x32xbf16, #tpu.memory_space<vmem>>, %arg18: memref<2x1x32xf32, #tpu.memory_space<vmem>>, %arg19: memref<2x1x32xf32, #tpu.memory_space<vmem>>, %arg20: memref<2x1x32xf32, #tpu.memory_space<vmem>>, %arg21: memref<2x32x64xbf16, #tpu.memory_space<vmem>>, %arg22: memref<2x1x64xf32, #tpu.memory_space<vmem>>, %arg23: memref<2x64x32xbf16, #tpu.memory_space<vmem>>, %arg24: memref<2x1x32xf32, #tpu.memory_space<vmem>>, %arg25: memref<1x32xf32, #tpu.memory_space<vmem>>, %arg26: memref<1x32xf32, #tpu.memory_space<vmem>>, %arg27: memref<1x8x32xf32, #tpu.memory_space<vmem>>) attributes {dimension_semantics = [#tpu.dimension_semantics<parallel>], iteration_bounds = array<i64: 2>, scalar_prefetch = 0 : i64, scratch_operands = 0 : i64, tpu.core_type = #tpu.core_type<tc>, window_params = [{transform_indices = @transform_0, window_bounds = array<i64: 1, 16, 32>}, {pipeline_mode = #tpu.pipeline_mode<synchronous>, transform_indices = @transform_1, window_bounds = array<i64: 32, 34>}, {pipeline_mode = #tpu.pipeline_mode<synchronous>, transform_indices = @transform_2, window_bounds = array<i64: 17, 8>}, {pipeline_mode = #tpu.pipeline_mode<synchronous>, transform_indices = @transform_3, window_bounds = array<i64: 8, 96>}, {pipeline_mode = #tpu.pipeline_mode<synchronous>, transform_indices = @transform_4, window_bounds = array<i64: 1, 32>}, {pipeline_mode = #tpu.pipeline_mode<synchronous>, transform_indices = @transform_5, window_bounds = array<i64: 3, 8, 16>}, {pipeline_mode = #tpu.pipeline_mode<synchronous>, transform_indices = @transform_6, window_bounds = array<i64: 32, 96>}, {pipeline_mode = #tpu.pipeline_mode<synchronous>, transform_indices = @transform_7, window_bounds = array<i64: 1, 32>}, {pipeline_mode = #tpu.pipeline_mode<synchronous>, transform_indices = @transform_8, window_bounds = array<i64: 8, 32>}, {pipeline_mode = #tpu.pipeline_mode<synchronous>, transform_indices = @transform_9, window_bounds = array<i64: 2, 1, 32>}, {pipeline_mode = #tpu.pipeline_mode<synchronous>, transform_indices = @transform_10, window_bounds = array<i64: 2, 1, 32>}, {pipeline_mode = #tpu.pipeline_mode<synchronous>, transform_indices = @transform_11, window_bounds = array<i64: 2, 32, 32>}, {pipeline_mode = #tpu.pipeline_mode<synchronous>, transform_indices = @transform_12, window_bounds = array<i64: 2, 1, 32>}, {pipeline_mode = #tpu.pipeline_mode<synchronous>, transform_indices = @transform_13, window_bounds = array<i64: 2, 32, 32>}, {pipeline_mode = #tpu.pipeline_mode<synchronous>, transform_indices = @transform_14, window_bounds = array<i64: 2, 32, 32>}, {pipeline_mode = #tpu.pipeline_mode<synchronous>, transform_indices = @transform_15, window_bounds = array<i64: 2, 1, 32>}, {pipeline_mode = #tpu.pipeline_mode<synchronous>, transform_indices = @transform_16, window_bounds = array<i64: 2, 32, 32>}, {pipeline_mode = #tpu.pipeline_mode<synchronous>, transform_indices = @transform_17, window_bounds = array<i64: 2, 1, 32>}, {pipeline_mode = #tpu.pipeline_mode<synchronous>, transform_indices = @transform_18, window_bounds = array<i64: 2, 1, 32>}, {pipeline_mode = #tpu.pipeline_mode<synchronous>, transform_indices = @transform_19, window_bounds = array<i64: 2, 1, 32>}, {pipeline_mode = #tpu.pipeline_mode<synchronous>, transform_indices = @transform_20, window_bounds = array<i64: 2, 32, 64>}, {pipeline_mode = #tpu.pipeline_mode<synchronous>, transform_indices = @transform_21, window_bounds = array<i64: 2, 1, 64>}, {pipeline_mode = #tpu.pipeline_mode<synchronous>, transform_indices = @transform_22, window_bounds = array<i64: 2, 64, 32>}, {pipeline_mode = #tpu.pipeline_mode<synchronous>, transform_indices = @transform_23, window_bounds = array<i64: 2, 1, 32>}, {pipeline_mode = #tpu.pipeline_mode<synchronous>, transform_indices = @transform_24, window_bounds = array<i64: 1, 32>}, {pipeline_mode = #tpu.pipeline_mode<synchronous>, transform_indices = @transform_25, window_bounds = array<i64: 1, 32>}, {transform_indices = @transform_26, window_bounds = array<i64: 1, 8, 32>}]} {
    %c0 = arith.constant 0 : index
    %c0_0 = arith.constant 0 : index
    %c0_1 = arith.constant 0 : index
    %0 = vector.load %arg1[%c0, %c0_0, %c0_1] : memref<1x16x32xf32, #tpu.memory_space<vmem>>, vector<1x16x32xf32>
    %1 = vector.shape_cast %0 : vector<1x16x32xf32> to vector<16x32xf32>
    %2 = arith.truncf %1 : vector<16x32xf32> to vector<16x32xbf16>
    %c0_2 = arith.constant 0 : index
    %c0_3 = arith.constant 0 : index
    %3 = vector.load %arg2[%c0_2, %c0_3] : memref<32x34xbf16, #tpu.memory_space<vmem>>, vector<32x34xbf16>
    %cst = arith.constant dense<0.000000e+00> : vector<16x34xf32>
    %4 = tpu.matmul %2, %3, %cst {dimension_numbers = #tpu.dot_dimension_numbers<[1], [0], [0], [1], [0, 0, 1, 1], [], []>} : vector<16x32xbf16>, vector<32x34xbf16>, vector<16x34xf32> -> vector<16x34xf32>
    %5 = vector.extract_strided_slice %4 {offsets = [0, 0], sizes = [16, 17], strides = [1, 1]} : vector<16x34xf32> to vector<16x17xf32>
    %6 = vector.extract_strided_slice %4 {offsets = [0, 17], sizes = [16, 17], strides = [1, 1]} : vector<16x34xf32> to vector<16x17xf32>
    %7 = arith.mulf %5, %5 : vector<16x17xf32>
    %8 = arith.mulf %6, %6 : vector<16x17xf32>
    %9 = arith.addf %7, %8 : vector<16x17xf32>
    %10 = arith.truncf %9 : vector<16x17xf32> to vector<16x17xbf16>
    %c0_4 = arith.constant 0 : index
    %c0_5 = arith.constant 0 : index
    %11 = vector.load %arg3[%c0_4, %c0_5] : memref<17x8xbf16, #tpu.memory_space<vmem>>, vector<17x8xbf16>
    %cst_6 = arith.constant dense<0.000000e+00> : vector<16x8xf32>
    %12 = tpu.matmul %10, %11, %cst_6 {dimension_numbers = #tpu.dot_dimension_numbers<[1], [0], [0], [1], [0, 0, 1, 1], [], []>} : vector<16x17xbf16>, vector<17x8xbf16>, vector<16x8xf32> -> vector<16x8xf32>
    %cst_7 = arith.constant 1.000000e-10 : f32
    %13 = vector.broadcast %cst_7 : f32 to vector<16x8xf32>
    %14 = arith.maximumf %12, %13 : vector<16x8xf32>
    %15 = math.log %14 : vector<16x8xf32>
    %cst_8 = arith.constant 0.434294492 : f32
    %16 = vector.broadcast %cst_8 : f32 to vector<16x8xf32>
    %17 = arith.mulf %15, %16 : vector<16x8xf32>
    %cst_9 = arith.constant dense<0xFF800000> : vector<16xf32>
    %18 = vector.multi_reduction <maximumf>, %17, %cst_9 [1] : vector<16x8xf32> to vector<16xf32>
    %19 = vector.shape_cast %18 : vector<16xf32> to vector<16x1xf32>
    %20 = vector.shape_cast %19 : vector<16x1xf32> to vector<1x16x1xf32>
    %cst_10 = arith.constant dense<0xFF800000> : vector<1xf32>
    %21 = vector.multi_reduction <maximumf>, %20, %cst_10 [1, 2] : vector<1x16x1xf32> to vector<1xf32>
    %22 = vector.shape_cast %21 : vector<1xf32> to vector<1x1x1xf32>
    %23 = vector.extract %22[0, 0, 0] : f32 from vector<1x1x1xf32>
    %cst_11 = arith.constant 8.000000e+00 : f32
    %24 = arith.subf %23, %cst_11 : f32
    %25 = vector.broadcast %24 : f32 to vector<16x8xf32>
    %26 = arith.maximumf %17, %25 : vector<16x8xf32>
    %cst_12 = arith.constant 4.000000e+00 : f32
    %27 = vector.broadcast %cst_12 : f32 to vector<16x8xf32>
    %28 = arith.addf %26, %27 : vector<16x8xf32>
    %cst_13 = arith.constant 2.500000e-01 : f32
    %29 = vector.broadcast %cst_13 : f32 to vector<16x8xf32>
    %30 = arith.mulf %28, %29 : vector<16x8xf32>
    %31 = tpu.iota {dimensions = array<i32: 0>} : vector<16x1xi32>
    %32 = arith.truncf %30 : vector<16x8xf32> to vector<16x8xbf16>
    %c0_14 = arith.constant 0 : index
    %c0_15 = arith.constant 0 : index
    %33 = vector.load %arg4[%c0_14, %c0_15] : memref<8x96xbf16, #tpu.memory_space<vmem>>, vector<8x96xbf16>
    %cst_16 = arith.constant dense<0.000000e+00> : vector<16x96xf32>
    %34 = tpu.matmul %32, %33, %cst_16 {dimension_numbers = #tpu.dot_dimension_numbers<[1], [0], [0], [1], [0, 0, 1, 1], [], []>} : vector<16x8xbf16>, vector<8x96xbf16>, vector<16x96xf32> -> vector<16x96xf32>
    %35 = vector.extract_strided_slice %34 {offsets = [0, 32], sizes = [16, 32], strides = [1, 1]} : vector<16x96xf32> to vector<16x32xf32>
    %36 = vector.extract_strided_slice %34 {offsets = [0, 0], sizes = [16, 32], strides = [1, 1]} : vector<16x96xf32> to vector<16x32xf32>
    %c1_i32 = arith.constant 1 : i32
    %37 = tpu.dynamic_rotate %36 by %c1_i32 dim 0 : vector<16x32xf32>, i32 -> vector<16x32xf32>
    %c0_i32 = arith.constant 0 : i32
    %38 = vector.broadcast %c0_i32 : i32 to vector<16x1xi32>
    %39 = arith.cmpi sgt, %31, %38 : vector<16x1xi32>
    %cst_17 = arith.constant 0.000000e+00 : f32
    %40 = vector.shape_cast %39 : vector<16x1xi1> to vector<16x1xi1>
    %41 = vector.broadcast %40 : vector<16x1xi1> to vector<16x32xi1>
    %42 = vector.broadcast %cst_17 : f32 to vector<16x32xf32>
    %43 = arith.select %41, %37, %42 : vector<16x32xi1>, vector<16x32xf32>
    %44 = arith.addf %35, %43 : vector<16x32xf32>
    %45 = vector.extract_strided_slice %34 {offsets = [0, 64], sizes = [16, 32], strides = [1, 1]} : vector<16x96xf32> to vector<16x32xf32>
    %c15_i32 = arith.constant 15 : i32
    %46 = tpu.dynamic_rotate %45 by %c15_i32 dim 0 : vector<16x32xf32>, i32 -> vector<16x32xf32>
    %c15_i32_18 = arith.constant 15 : i32
    %47 = vector.broadcast %c15_i32_18 : i32 to vector<16x1xi32>
    %48 = arith.cmpi slt, %31, %47 : vector<16x1xi32>
    %cst_19 = arith.constant 0.000000e+00 : f32
    %49 = vector.shape_cast %48 : vector<16x1xi1> to vector<16x1xi1>
    %50 = vector.broadcast %49 : vector<16x1xi1> to vector<16x32xi1>
    %51 = vector.broadcast %cst_19 : f32 to vector<16x32xf32>
    %52 = arith.select %50, %46, %51 : vector<16x32xi1>, vector<16x32xf32>
    %53 = arith.addf %44, %52 : vector<16x32xf32>
    %c0_20 = arith.constant 0 : index
    %c0_21 = arith.constant 0 : index
    %54 = vector.load %arg5[%c0_20, %c0_21] : memref<1x32xf32, #tpu.memory_space<vmem>>, vector<1x32xf32>
    %55 = vector.broadcast %54 : vector<1x32xf32> to vector<16x32xf32>
    %56 = arith.addf %53, %55 : vector<16x32xf32>
    %cst_22 = arith.constant 5.000000e-01 : f32
    %57 = vector.broadcast %cst_22 : f32 to vector<16x32xf32>
    %58 = arith.mulf %57, %56 : vector<16x32xf32>
    %cst_23 = arith.constant 0.707106769 : f32
    %59 = vector.broadcast %cst_23 : f32 to vector<16x32xf32>
    %60 = arith.mulf %56, %59 : vector<16x32xf32>
    %61 = math.erf %60 : vector<16x32xf32>
    %cst_24 = arith.constant 1.000000e+00 : f32
    %62 = vector.broadcast %cst_24 : f32 to vector<16x32xf32>
    %63 = arith.addf %62, %61 : vector<16x32xf32>
    %64 = arith.mulf %58, %63 : vector<16x32xf32>
    %65 = arith.truncf %64 : vector<16x32xf32> to vector<16x32xbf16>
    %c0_25 = arith.constant 0 : index
    %c0_26 = arith.constant 0 : index
    %66 = vector.load %arg7[%c0_25, %c0_26] : memref<32x96xbf16, #tpu.memory_space<vmem>>, vector<32x96xbf16>
    %cst_27 = arith.constant dense<0.000000e+00> : vector<16x96xf32>
    %67 = tpu.matmul %65, %66, %cst_27 {dimension_numbers = #tpu.dot_dimension_numbers<[1], [0], [0], [1], [0, 0, 1, 1], [], []>} : vector<16x32xbf16>, vector<32x96xbf16>, vector<16x96xf32> -> vector<16x96xf32>
    %c0_28 = arith.constant 0 : index
    %c0_29 = arith.constant 0 : index
    %c0_30 = arith.constant 0 : index
    %68 = vector.load %arg6[%c0_28, %c0_29, %c0_30] : memref<3x8x16xbf16, #tpu.memory_space<vmem>>, vector<1x8x16xbf16>
    %69 = vector.shape_cast %68 : vector<1x8x16xbf16> to vector<8x16xbf16>
    %70 = vector.extract_strided_slice %67 {offsets = [0, 0], sizes = [16, 32], strides = [1, 1]} : vector<16x96xf32> to vector<16x32xf32>
    %71 = arith.truncf %70 : vector<16x32xf32> to vector<16x32xbf16>
    %cst_31 = arith.constant dense<0.000000e+00> : vector<8x32xf32>
    %72 = tpu.matmul %69, %71, %cst_31 {dimension_numbers = #tpu.dot_dimension_numbers<[1], [0], [0], [1], [0, 0, 1, 1], [], []>} : vector<8x16xbf16>, vector<16x32xbf16>, vector<8x32xf32> -> vector<8x32xf32>
    %c1 = arith.constant 1 : index
    %c0_32 = arith.constant 0 : index
    %c0_33 = arith.constant 0 : index
    %73 = vector.load %arg6[%c1, %c0_32, %c0_33] : memref<3x8x16xbf16, #tpu.memory_space<vmem>>, vector<1x8x16xbf16>
    %74 = vector.shape_cast %73 : vector<1x8x16xbf16> to vector<8x16xbf16>
    %75 = vector.extract_strided_slice %67 {offsets = [0, 32], sizes = [16, 32], strides = [1, 1]} : vector<16x96xf32> to vector<16x32xf32>
    %76 = arith.truncf %75 : vector<16x32xf32> to vector<16x32xbf16>
    %cst_34 = arith.constant dense<0.000000e+00> : vector<8x32xf32>
    %77 = tpu.matmul %74, %76, %cst_34 {dimension_numbers = #tpu.dot_dimension_numbers<[1], [0], [0], [1], [0, 0, 1, 1], [], []>} : vector<8x16xbf16>, vector<16x32xbf16>, vector<8x32xf32> -> vector<8x32xf32>
    %78 = arith.addf %72, %77 : vector<8x32xf32>
    %c2 = arith.constant 2 : index
    %c0_35 = arith.constant 0 : index
    %c0_36 = arith.constant 0 : index
    %79 = vector.load %arg6[%c2, %c0_35, %c0_36] : memref<3x8x16xbf16, #tpu.memory_space<vmem>>, vector<1x8x16xbf16>
    %80 = vector.shape_cast %79 : vector<1x8x16xbf16> to vector<8x16xbf16>
    %81 = vector.extract_strided_slice %67 {offsets = [0, 64], sizes = [16, 32], strides = [1, 1]} : vector<16x96xf32> to vector<16x32xf32>
    %82 = arith.truncf %81 : vector<16x32xf32> to vector<16x32xbf16>
    %cst_37 = arith.constant dense<0.000000e+00> : vector<8x32xf32>
    %83 = tpu.matmul %80, %82, %cst_37 {dimension_numbers = #tpu.dot_dimension_numbers<[1], [0], [0], [1], [0, 0, 1, 1], [], []>} : vector<8x16xbf16>, vector<16x32xbf16>, vector<8x32xf32> -> vector<8x32xf32>
    %84 = arith.addf %78, %83 : vector<8x32xf32>
    %c0_38 = arith.constant 0 : index
    %c0_39 = arith.constant 0 : index
    %85 = vector.load %arg8[%c0_38, %c0_39] : memref<1x32xf32, #tpu.memory_space<vmem>>, vector<1x32xf32>
    %86 = vector.broadcast %85 : vector<1x32xf32> to vector<8x32xf32>
    %87 = arith.addf %84, %86 : vector<8x32xf32>
    %cst_40 = arith.constant 5.000000e-01 : f32
    %88 = vector.broadcast %cst_40 : f32 to vector<8x32xf32>
    %89 = arith.mulf %88, %87 : vector<8x32xf32>
    %cst_41 = arith.constant 0.707106769 : f32
    %90 = vector.broadcast %cst_41 : f32 to vector<8x32xf32>
    %91 = arith.mulf %87, %90 : vector<8x32xf32>
    %92 = math.erf %91 : vector<8x32xf32>
    %cst_42 = arith.constant 1.000000e+00 : f32
    %93 = vector.broadcast %cst_42 : f32 to vector<8x32xf32>
    %94 = arith.addf %93, %92 : vector<8x32xf32>
    %95 = arith.mulf %89, %94 : vector<8x32xf32>
    %c0_43 = arith.constant 0 : index
    %c0_44 = arith.constant 0 : index
    %96 = vector.load %arg9[%c0_43, %c0_44] : memref<8x32xf32, #tpu.memory_space<vmem>>, vector<8x32xf32>
    %97 = arith.addf %95, %96 : vector<8x32xf32>
    %c0_45 = arith.constant 0 : index
    %c0_46 = arith.constant 0 : index
    %c0_47 = arith.constant 0 : index
    %98 = vector.load %arg10[%c0_45, %c0_46, %c0_47] : memref<2x1x32xf32, #tpu.memory_space<vmem>>, vector<1x1x32xf32>
    %99 = vector.shape_cast %98 : vector<1x1x32xf32> to vector<1x32xf32>
    %c0_48 = arith.constant 0 : index
    %c0_49 = arith.constant 0 : index
    %c0_50 = arith.constant 0 : index
    %100 = vector.load %arg11[%c0_48, %c0_49, %c0_50] : memref<2x1x32xf32, #tpu.memory_space<vmem>>, vector<1x1x32xf32>
    %101 = vector.shape_cast %100 : vector<1x1x32xf32> to vector<1x32xf32>
    %cst_51 = arith.constant dense<0.000000e+00> : vector<8xf32>
    %102 = vector.multi_reduction <add>, %97, %cst_51 [1] : vector<8x32xf32> to vector<8xf32>
    %103 = vector.shape_cast %102 : vector<8xf32> to vector<8x1xf32>
    %cst_52 = arith.constant 3.200000e+01 : f32
    %104 = vector.broadcast %cst_52 : f32 to vector<8x1xf32>
    %105 = arith.divf %103, %104 : vector<8x1xf32>
    %106 = vector.broadcast %105 : vector<8x1xf32> to vector<8x32xf32>
    %107 = arith.subf %97, %106 : vector<8x32xf32>
    %108 = arith.mulf %107, %107 : vector<8x32xf32>
    %cst_53 = arith.constant dense<0.000000e+00> : vector<8xf32>
    %109 = vector.multi_reduction <add>, %108, %cst_53 [1] : vector<8x32xf32> to vector<8xf32>
    %110 = vector.shape_cast %109 : vector<8xf32> to vector<8x1xf32>
    %cst_54 = arith.constant 3.200000e+01 : f32
    %111 = vector.broadcast %cst_54 : f32 to vector<8x1xf32>
    %112 = arith.divf %110, %111 : vector<8x1xf32>
    %113 = vector.broadcast %105 : vector<8x1xf32> to vector<8x32xf32>
    %114 = arith.subf %97, %113 : vector<8x32xf32>
    %cst_55 = arith.constant 9.99999974E-6 : f32
    %115 = vector.broadcast %cst_55 : f32 to vector<8x1xf32>
    %116 = arith.addf %112, %115 : vector<8x1xf32>
    %117 = math.rsqrt %116 : vector<8x1xf32>
    %118 = vector.broadcast %117 : vector<8x1xf32> to vector<8x32xf32>
    %119 = arith.mulf %114, %118 : vector<8x32xf32>
    %120 = vector.broadcast %99 : vector<1x32xf32> to vector<8x32xf32>
    %121 = arith.mulf %119, %120 : vector<8x32xf32>
    %122 = vector.broadcast %101 : vector<1x32xf32> to vector<8x32xf32>
    %123 = arith.addf %121, %122 : vector<8x32xf32>
    %124 = arith.truncf %123 : vector<8x32xf32> to vector<8x32xbf16>
    %c0_56 = arith.constant 0 : index
    %c0_57 = arith.constant 0 : index
    %c0_58 = arith.constant 0 : index
    %125 = vector.load %arg12[%c0_56, %c0_57, %c0_58] : memref<2x32x32xbf16, #tpu.memory_space<vmem>>, vector<1x32x32xbf16>
    %126 = vector.shape_cast %125 : vector<1x32x32xbf16> to vector<32x32xbf16>
    %cst_59 = arith.constant dense<0.000000e+00> : vector<8x32xf32>
    %127 = tpu.matmul %124, %126, %cst_59 {dimension_numbers = #tpu.dot_dimension_numbers<[1], [0], [0], [1], [0, 0, 1, 1], [], []>} : vector<8x32xbf16>, vector<32x32xbf16>, vector<8x32xf32> -> vector<8x32xf32>
    %c0_60 = arith.constant 0 : index
    %c0_61 = arith.constant 0 : index
    %c0_62 = arith.constant 0 : index
    %128 = vector.load %arg13[%c0_60, %c0_61, %c0_62] : memref<2x1x32xf32, #tpu.memory_space<vmem>>, vector<1x1x32xf32>
    %129 = vector.shape_cast %128 : vector<1x1x32xf32> to vector<1x32xf32>
    %130 = vector.broadcast %129 : vector<1x32xf32> to vector<8x32xf32>
    %131 = arith.addf %127, %130 : vector<8x32xf32>
    %cst_63 = arith.constant 0.353553385 : f32
    %132 = vector.broadcast %cst_63 : f32 to vector<8x32xf32>
    %133 = arith.mulf %131, %132 : vector<8x32xf32>
    %c0_64 = arith.constant 0 : index
    %c0_65 = arith.constant 0 : index
    %c0_66 = arith.constant 0 : index
    %134 = vector.load %arg14[%c0_64, %c0_65, %c0_66] : memref<2x32x32xbf16, #tpu.memory_space<vmem>>, vector<1x32x32xbf16>
    %135 = vector.shape_cast %134 : vector<1x32x32xbf16> to vector<32x32xbf16>
    %cst_67 = arith.constant dense<0.000000e+00> : vector<8x32xf32>
    %136 = tpu.matmul %124, %135, %cst_67 {dimension_numbers = #tpu.dot_dimension_numbers<[1], [0], [0], [1], [0, 0, 1, 1], [], []>} : vector<8x32xbf16>, vector<32x32xbf16>, vector<8x32xf32> -> vector<8x32xf32>
    %c0_68 = arith.constant 0 : index
    %c0_69 = arith.constant 0 : index
    %c0_70 = arith.constant 0 : index
    %137 = vector.load %arg15[%c0_68, %c0_69, %c0_70] : memref<2x32x32xbf16, #tpu.memory_space<vmem>>, vector<1x32x32xbf16>
    %138 = vector.shape_cast %137 : vector<1x32x32xbf16> to vector<32x32xbf16>
    %cst_71 = arith.constant dense<0.000000e+00> : vector<8x32xf32>
    %139 = tpu.matmul %124, %138, %cst_71 {dimension_numbers = #tpu.dot_dimension_numbers<[1], [0], [0], [1], [0, 0, 1, 1], [], []>} : vector<8x32xbf16>, vector<32x32xbf16>, vector<8x32xf32> -> vector<8x32xf32>
    %c0_72 = arith.constant 0 : index
    %c0_73 = arith.constant 0 : index
    %c0_74 = arith.constant 0 : index
    %140 = vector.load %arg16[%c0_72, %c0_73, %c0_74] : memref<2x1x32xf32, #tpu.memory_space<vmem>>, vector<1x1x32xf32>
    %141 = vector.shape_cast %140 : vector<1x1x32xf32> to vector<1x32xf32>
    %142 = vector.broadcast %141 : vector<1x32xf32> to vector<8x32xf32>
    %143 = arith.addf %139, %142 : vector<8x32xf32>
    %144 = vector.extract_strided_slice %133 {offsets = [0, 0], sizes = [8, 8], strides = [1, 1]} : vector<8x32xf32> to vector<8x8xf32>
    %145 = arith.truncf %144 : vector<8x8xf32> to vector<8x8xbf16>
    %146 = vector.extract_strided_slice %136 {offsets = [0, 0], sizes = [8, 8], strides = [1, 1]} : vector<8x32xf32> to vector<8x8xf32>
    %147 = arith.truncf %146 : vector<8x8xf32> to vector<8x8xbf16>
    %148 = vector.extract_strided_slice %143 {offsets = [0, 0], sizes = [8, 8], strides = [1, 1]} : vector<8x32xf32> to vector<8x8xf32>
    %149 = arith.truncf %148 : vector<8x8xf32> to vector<8x8xbf16>
    %cst_75 = arith.constant dense<0.000000e+00> : vector<8x8xf32>
    %150 = tpu.matmul %145, %147, %cst_75 {dimension_numbers = #tpu.dot_dimension_numbers<[1], [1], [0], [0], [0, 0, 1, 0], [], []>} : vector<8x8xbf16>, vector<8x8xbf16>, vector<8x8xf32> -> vector<8x8xf32>
    %cst_76 = arith.constant dense<0xFF800000> : vector<8xf32>
    %151 = vector.multi_reduction <maximumf>, %150, %cst_76 [1] : vector<8x8xf32> to vector<8xf32>
    %152 = vector.shape_cast %151 : vector<8xf32> to vector<8x1xf32>
    %153 = vector.broadcast %152 : vector<8x1xf32> to vector<8x8xf32>
    %154 = arith.subf %150, %153 : vector<8x8xf32>
    %155 = math.exp %154 : vector<8x8xf32>
    %cst_77 = arith.constant dense<0.000000e+00> : vector<8xf32>
    %156 = vector.multi_reduction <add>, %155, %cst_77 [1] : vector<8x8xf32> to vector<8xf32>
    %157 = vector.shape_cast %156 : vector<8xf32> to vector<8x1xf32>
    %158 = tpu.reciprocal %157 {approx = true} : vector<8x1xf32> -> vector<8x1xf32>
    %159 = vector.broadcast %158 : vector<8x1xf32> to vector<8x8xf32>
    %160 = arith.mulf %155, %159 : vector<8x8xf32>
    %161 = arith.truncf %160 : vector<8x8xf32> to vector<8x8xbf16>
    %cst_78 = arith.constant dense<0.000000e+00> : vector<8x8xf32>
    %162 = tpu.matmul %161, %149, %cst_78 {dimension_numbers = #tpu.dot_dimension_numbers<[1], [0], [0], [1], [0, 0, 1, 1], [], []>} : vector<8x8xbf16>, vector<8x8xbf16>, vector<8x8xf32> -> vector<8x8xf32>
    %163 = vector.extract_strided_slice %133 {offsets = [0, 8], sizes = [8, 8], strides = [1, 1]} : vector<8x32xf32> to vector<8x8xf32>
    %164 = arith.truncf %163 : vector<8x8xf32> to vector<8x8xbf16>
    %165 = vector.extract_strided_slice %136 {offsets = [0, 8], sizes = [8, 8], strides = [1, 1]} : vector<8x32xf32> to vector<8x8xf32>
    %166 = arith.truncf %165 : vector<8x8xf32> to vector<8x8xbf16>
    %167 = vector.extract_strided_slice %143 {offsets = [0, 8], sizes = [8, 8], strides = [1, 1]} : vector<8x32xf32> to vector<8x8xf32>
    %168 = arith.truncf %167 : vector<8x8xf32> to vector<8x8xbf16>
    %cst_79 = arith.constant dense<0.000000e+00> : vector<8x8xf32>
    %169 = tpu.matmul %164, %166, %cst_79 {dimension_numbers = #tpu.dot_dimension_numbers<[1], [1], [0], [0], [0, 0, 1, 0], [], []>} : vector<8x8xbf16>, vector<8x8xbf16>, vector<8x8xf32> -> vector<8x8xf32>
    %cst_80 = arith.constant dense<0xFF800000> : vector<8xf32>
    %170 = vector.multi_reduction <maximumf>, %169, %cst_80 [1] : vector<8x8xf32> to vector<8xf32>
    %171 = vector.shape_cast %170 : vector<8xf32> to vector<8x1xf32>
    %172 = vector.broadcast %171 : vector<8x1xf32> to vector<8x8xf32>
    %173 = arith.subf %169, %172 : vector<8x8xf32>
    %174 = math.exp %173 : vector<8x8xf32>
    %cst_81 = arith.constant dense<0.000000e+00> : vector<8xf32>
    %175 = vector.multi_reduction <add>, %174, %cst_81 [1] : vector<8x8xf32> to vector<8xf32>
    %176 = vector.shape_cast %175 : vector<8xf32> to vector<8x1xf32>
    %177 = tpu.reciprocal %176 {approx = true} : vector<8x1xf32> -> vector<8x1xf32>
    %178 = vector.broadcast %177 : vector<8x1xf32> to vector<8x8xf32>
    %179 = arith.mulf %174, %178 : vector<8x8xf32>
    %180 = arith.truncf %179 : vector<8x8xf32> to vector<8x8xbf16>
    %cst_82 = arith.constant dense<0.000000e+00> : vector<8x8xf32>
    %181 = tpu.matmul %180, %168, %cst_82 {dimension_numbers = #tpu.dot_dimension_numbers<[1], [0], [0], [1], [0, 0, 1, 1], [], []>} : vector<8x8xbf16>, vector<8x8xbf16>, vector<8x8xf32> -> vector<8x8xf32>
    %182 = vector.extract_strided_slice %133 {offsets = [0, 16], sizes = [8, 8], strides = [1, 1]} : vector<8x32xf32> to vector<8x8xf32>
    %183 = arith.truncf %182 : vector<8x8xf32> to vector<8x8xbf16>
    %184 = vector.extract_strided_slice %136 {offsets = [0, 16], sizes = [8, 8], strides = [1, 1]} : vector<8x32xf32> to vector<8x8xf32>
    %185 = arith.truncf %184 : vector<8x8xf32> to vector<8x8xbf16>
    %186 = vector.extract_strided_slice %143 {offsets = [0, 16], sizes = [8, 8], strides = [1, 1]} : vector<8x32xf32> to vector<8x8xf32>
    %187 = arith.truncf %186 : vector<8x8xf32> to vector<8x8xbf16>
    %cst_83 = arith.constant dense<0.000000e+00> : vector<8x8xf32>
    %188 = tpu.matmul %183, %185, %cst_83 {dimension_numbers = #tpu.dot_dimension_numbers<[1], [1], [0], [0], [0, 0, 1, 0], [], []>} : vector<8x8xbf16>, vector<8x8xbf16>, vector<8x8xf32> -> vector<8x8xf32>
    %cst_84 = arith.constant dense<0xFF800000> : vector<8xf32>
    %189 = vector.multi_reduction <maximumf>, %188, %cst_84 [1] : vector<8x8xf32> to vector<8xf32>
    %190 = vector.shape_cast %189 : vector<8xf32> to vector<8x1xf32>
    %191 = vector.broadcast %190 : vector<8x1xf32> to vector<8x8xf32>
    %192 = arith.subf %188, %191 : vector<8x8xf32>
    %193 = math.exp %192 : vector<8x8xf32>
    %cst_85 = arith.constant dense<0.000000e+00> : vector<8xf32>
    %194 = vector.multi_reduction <add>, %193, %cst_85 [1] : vector<8x8xf32> to vector<8xf32>
    %195 = vector.shape_cast %194 : vector<8xf32> to vector<8x1xf32>
    %196 = tpu.reciprocal %195 {approx = true} : vector<8x1xf32> -> vector<8x1xf32>
    %197 = vector.broadcast %196 : vector<8x1xf32> to vector<8x8xf32>
    %198 = arith.mulf %193, %197 : vector<8x8xf32>
    %199 = arith.truncf %198 : vector<8x8xf32> to vector<8x8xbf16>
    %cst_86 = arith.constant dense<0.000000e+00> : vector<8x8xf32>
    %200 = tpu.matmul %199, %187, %cst_86 {dimension_numbers = #tpu.dot_dimension_numbers<[1], [0], [0], [1], [0, 0, 1, 1], [], []>} : vector<8x8xbf16>, vector<8x8xbf16>, vector<8x8xf32> -> vector<8x8xf32>
    %201 = vector.extract_strided_slice %133 {offsets = [0, 24], sizes = [8, 8], strides = [1, 1]} : vector<8x32xf32> to vector<8x8xf32>
    %202 = arith.truncf %201 : vector<8x8xf32> to vector<8x8xbf16>
    %203 = vector.extract_strided_slice %136 {offsets = [0, 24], sizes = [8, 8], strides = [1, 1]} : vector<8x32xf32> to vector<8x8xf32>
    %204 = arith.truncf %203 : vector<8x8xf32> to vector<8x8xbf16>
    %205 = vector.extract_strided_slice %143 {offsets = [0, 24], sizes = [8, 8], strides = [1, 1]} : vector<8x32xf32> to vector<8x8xf32>
    %206 = arith.truncf %205 : vector<8x8xf32> to vector<8x8xbf16>
    %cst_87 = arith.constant dense<0.000000e+00> : vector<8x8xf32>
    %207 = tpu.matmul %202, %204, %cst_87 {dimension_numbers = #tpu.dot_dimension_numbers<[1], [1], [0], [0], [0, 0, 1, 0], [], []>} : vector<8x8xbf16>, vector<8x8xbf16>, vector<8x8xf32> -> vector<8x8xf32>
    %cst_88 = arith.constant dense<0xFF800000> : vector<8xf32>
    %208 = vector.multi_reduction <maximumf>, %207, %cst_88 [1] : vector<8x8xf32> to vector<8xf32>
    %209 = vector.shape_cast %208 : vector<8xf32> to vector<8x1xf32>
    %210 = vector.broadcast %209 : vector<8x1xf32> to vector<8x8xf32>
    %211 = arith.subf %207, %210 : vector<8x8xf32>
    %212 = math.exp %211 : vector<8x8xf32>
    %cst_89 = arith.constant dense<0.000000e+00> : vector<8xf32>
    %213 = vector.multi_reduction <add>, %212, %cst_89 [1] : vector<8x8xf32> to vector<8xf32>
    %214 = vector.shape_cast %213 : vector<8xf32> to vector<8x1xf32>
    %215 = tpu.reciprocal %214 {approx = true} : vector<8x1xf32> -> vector<8x1xf32>
    %216 = vector.broadcast %215 : vector<8x1xf32> to vector<8x8xf32>
    %217 = arith.mulf %212, %216 : vector<8x8xf32>
    %218 = arith.truncf %217 : vector<8x8xf32> to vector<8x8xbf16>
    %cst_90 = arith.constant dense<0.000000e+00> : vector<8x8xf32>
    %219 = tpu.matmul %218, %206, %cst_90 {dimension_numbers = #tpu.dot_dimension_numbers<[1], [0], [0], [1], [0, 0, 1, 1], [], []>} : vector<8x8xbf16>, vector<8x8xbf16>, vector<8x8xf32> -> vector<8x8xf32>
    %220 = tpu.concatenate %162, %181, %200, %219 in 1 : vector<8x8xf32>, vector<8x8xf32>, vector<8x8xf32>, vector<8x8xf32> -> vector<8x32xf32>
    %221 = arith.truncf %220 : vector<8x32xf32> to vector<8x32xbf16>
    %c0_91 = arith.constant 0 : index
    %c0_92 = arith.constant 0 : index
    %c0_93 = arith.constant 0 : index
    %222 = vector.load %arg17[%c0_91, %c0_92, %c0_93] : memref<2x32x32xbf16, #tpu.memory_space<vmem>>, vector<1x32x32xbf16>
    %223 = vector.shape_cast %222 : vector<1x32x32xbf16> to vector<32x32xbf16>
    %cst_94 = arith.constant dense<0.000000e+00> : vector<8x32xf32>
    %224 = tpu.matmul %221, %223, %cst_94 {dimension_numbers = #tpu.dot_dimension_numbers<[1], [0], [0], [1], [0, 0, 1, 1], [], []>} : vector<8x32xbf16>, vector<32x32xbf16>, vector<8x32xf32> -> vector<8x32xf32>
    %c0_95 = arith.constant 0 : index
    %c0_96 = arith.constant 0 : index
    %c0_97 = arith.constant 0 : index
    %225 = vector.load %arg18[%c0_95, %c0_96, %c0_97] : memref<2x1x32xf32, #tpu.memory_space<vmem>>, vector<1x1x32xf32>
    %226 = vector.shape_cast %225 : vector<1x1x32xf32> to vector<1x32xf32>
    %227 = vector.broadcast %226 : vector<1x32xf32> to vector<8x32xf32>
    %228 = arith.addf %224, %227 : vector<8x32xf32>
    %229 = arith.addf %97, %228 : vector<8x32xf32>
    %c0_98 = arith.constant 0 : index
    %c0_99 = arith.constant 0 : index
    %c0_100 = arith.constant 0 : index
    %230 = vector.load %arg19[%c0_98, %c0_99, %c0_100] : memref<2x1x32xf32, #tpu.memory_space<vmem>>, vector<1x1x32xf32>
    %231 = vector.shape_cast %230 : vector<1x1x32xf32> to vector<1x32xf32>
    %c0_101 = arith.constant 0 : index
    %c0_102 = arith.constant 0 : index
    %c0_103 = arith.constant 0 : index
    %232 = vector.load %arg20[%c0_101, %c0_102, %c0_103] : memref<2x1x32xf32, #tpu.memory_space<vmem>>, vector<1x1x32xf32>
    %233 = vector.shape_cast %232 : vector<1x1x32xf32> to vector<1x32xf32>
    %cst_104 = arith.constant dense<0.000000e+00> : vector<8xf32>
    %234 = vector.multi_reduction <add>, %229, %cst_104 [1] : vector<8x32xf32> to vector<8xf32>
    %235 = vector.shape_cast %234 : vector<8xf32> to vector<8x1xf32>
    %cst_105 = arith.constant 3.200000e+01 : f32
    %236 = vector.broadcast %cst_105 : f32 to vector<8x1xf32>
    %237 = arith.divf %235, %236 : vector<8x1xf32>
    %238 = vector.broadcast %237 : vector<8x1xf32> to vector<8x32xf32>
    %239 = arith.subf %229, %238 : vector<8x32xf32>
    %240 = arith.mulf %239, %239 : vector<8x32xf32>
    %cst_106 = arith.constant dense<0.000000e+00> : vector<8xf32>
    %241 = vector.multi_reduction <add>, %240, %cst_106 [1] : vector<8x32xf32> to vector<8xf32>
    %242 = vector.shape_cast %241 : vector<8xf32> to vector<8x1xf32>
    %cst_107 = arith.constant 3.200000e+01 : f32
    %243 = vector.broadcast %cst_107 : f32 to vector<8x1xf32>
    %244 = arith.divf %242, %243 : vector<8x1xf32>
    %245 = vector.broadcast %237 : vector<8x1xf32> to vector<8x32xf32>
    %246 = arith.subf %229, %245 : vector<8x32xf32>
    %cst_108 = arith.constant 9.99999974E-6 : f32
    %247 = vector.broadcast %cst_108 : f32 to vector<8x1xf32>
    %248 = arith.addf %244, %247 : vector<8x1xf32>
    %249 = math.rsqrt %248 : vector<8x1xf32>
    %250 = vector.broadcast %249 : vector<8x1xf32> to vector<8x32xf32>
    %251 = arith.mulf %246, %250 : vector<8x32xf32>
    %252 = vector.broadcast %231 : vector<1x32xf32> to vector<8x32xf32>
    %253 = arith.mulf %251, %252 : vector<8x32xf32>
    %254 = vector.broadcast %233 : vector<1x32xf32> to vector<8x32xf32>
    %255 = arith.addf %253, %254 : vector<8x32xf32>
    %256 = arith.truncf %255 : vector<8x32xf32> to vector<8x32xbf16>
    %c0_109 = arith.constant 0 : index
    %c0_110 = arith.constant 0 : index
    %c0_111 = arith.constant 0 : index
    %257 = vector.load %arg21[%c0_109, %c0_110, %c0_111] : memref<2x32x64xbf16, #tpu.memory_space<vmem>>, vector<1x32x64xbf16>
    %258 = vector.shape_cast %257 : vector<1x32x64xbf16> to vector<32x64xbf16>
    %cst_112 = arith.constant dense<0.000000e+00> : vector<8x64xf32>
    %259 = tpu.matmul %256, %258, %cst_112 {dimension_numbers = #tpu.dot_dimension_numbers<[1], [0], [0], [1], [0, 0, 1, 1], [], []>} : vector<8x32xbf16>, vector<32x64xbf16>, vector<8x64xf32> -> vector<8x64xf32>
    %c0_113 = arith.constant 0 : index
    %c0_114 = arith.constant 0 : index
    %c0_115 = arith.constant 0 : index
    %260 = vector.load %arg22[%c0_113, %c0_114, %c0_115] : memref<2x1x64xf32, #tpu.memory_space<vmem>>, vector<1x1x64xf32>
    %261 = vector.shape_cast %260 : vector<1x1x64xf32> to vector<1x64xf32>
    %262 = vector.broadcast %261 : vector<1x64xf32> to vector<8x64xf32>
    %263 = arith.addf %259, %262 : vector<8x64xf32>
    %cst_116 = arith.constant 5.000000e-01 : f32
    %264 = vector.broadcast %cst_116 : f32 to vector<8x64xf32>
    %265 = arith.mulf %264, %263 : vector<8x64xf32>
    %cst_117 = arith.constant 0.707106769 : f32
    %266 = vector.broadcast %cst_117 : f32 to vector<8x64xf32>
    %267 = arith.mulf %263, %266 : vector<8x64xf32>
    %268 = math.erf %267 : vector<8x64xf32>
    %cst_118 = arith.constant 1.000000e+00 : f32
    %269 = vector.broadcast %cst_118 : f32 to vector<8x64xf32>
    %270 = arith.addf %269, %268 : vector<8x64xf32>
    %271 = arith.mulf %265, %270 : vector<8x64xf32>
    %272 = arith.truncf %271 : vector<8x64xf32> to vector<8x64xbf16>
    %c0_119 = arith.constant 0 : index
    %c0_120 = arith.constant 0 : index
    %c0_121 = arith.constant 0 : index
    %273 = vector.load %arg23[%c0_119, %c0_120, %c0_121] : memref<2x64x32xbf16, #tpu.memory_space<vmem>>, vector<1x64x32xbf16>
    %274 = vector.shape_cast %273 : vector<1x64x32xbf16> to vector<64x32xbf16>
    %cst_122 = arith.constant dense<0.000000e+00> : vector<8x32xf32>
    %275 = tpu.matmul %272, %274, %cst_122 {dimension_numbers = #tpu.dot_dimension_numbers<[1], [0], [0], [1], [0, 0, 1, 1], [], []>} : vector<8x64xbf16>, vector<64x32xbf16>, vector<8x32xf32> -> vector<8x32xf32>
    %c0_123 = arith.constant 0 : index
    %c0_124 = arith.constant 0 : index
    %c0_125 = arith.constant 0 : index
    %276 = vector.load %arg24[%c0_123, %c0_124, %c0_125] : memref<2x1x32xf32, #tpu.memory_space<vmem>>, vector<1x1x32xf32>
    %277 = vector.shape_cast %276 : vector<1x1x32xf32> to vector<1x32xf32>
    %278 = vector.broadcast %277 : vector<1x32xf32> to vector<8x32xf32>
    %279 = arith.addf %275, %278 : vector<8x32xf32>
    %280 = arith.addf %229, %279 : vector<8x32xf32>
    %c1_126 = arith.constant 1 : index
    %c0_127 = arith.constant 0 : index
    %c0_128 = arith.constant 0 : index
    %281 = vector.load %arg10[%c1_126, %c0_127, %c0_128] : memref<2x1x32xf32, #tpu.memory_space<vmem>>, vector<1x1x32xf32>
    %282 = vector.shape_cast %281 : vector<1x1x32xf32> to vector<1x32xf32>
    %c1_129 = arith.constant 1 : index
    %c0_130 = arith.constant 0 : index
    %c0_131 = arith.constant 0 : index
    %283 = vector.load %arg11[%c1_129, %c0_130, %c0_131] : memref<2x1x32xf32, #tpu.memory_space<vmem>>, vector<1x1x32xf32>
    %284 = vector.shape_cast %283 : vector<1x1x32xf32> to vector<1x32xf32>
    %cst_132 = arith.constant dense<0.000000e+00> : vector<8xf32>
    %285 = vector.multi_reduction <add>, %280, %cst_132 [1] : vector<8x32xf32> to vector<8xf32>
    %286 = vector.shape_cast %285 : vector<8xf32> to vector<8x1xf32>
    %cst_133 = arith.constant 3.200000e+01 : f32
    %287 = vector.broadcast %cst_133 : f32 to vector<8x1xf32>
    %288 = arith.divf %286, %287 : vector<8x1xf32>
    %289 = vector.broadcast %288 : vector<8x1xf32> to vector<8x32xf32>
    %290 = arith.subf %280, %289 : vector<8x32xf32>
    %291 = arith.mulf %290, %290 : vector<8x32xf32>
    %cst_134 = arith.constant dense<0.000000e+00> : vector<8xf32>
    %292 = vector.multi_reduction <add>, %291, %cst_134 [1] : vector<8x32xf32> to vector<8xf32>
    %293 = vector.shape_cast %292 : vector<8xf32> to vector<8x1xf32>
    %cst_135 = arith.constant 3.200000e+01 : f32
    %294 = vector.broadcast %cst_135 : f32 to vector<8x1xf32>
    %295 = arith.divf %293, %294 : vector<8x1xf32>
    %296 = vector.broadcast %288 : vector<8x1xf32> to vector<8x32xf32>
    %297 = arith.subf %280, %296 : vector<8x32xf32>
    %cst_136 = arith.constant 9.99999974E-6 : f32
    %298 = vector.broadcast %cst_136 : f32 to vector<8x1xf32>
    %299 = arith.addf %295, %298 : vector<8x1xf32>
    %300 = math.rsqrt %299 : vector<8x1xf32>
    %301 = vector.broadcast %300 : vector<8x1xf32> to vector<8x32xf32>
    %302 = arith.mulf %297, %301 : vector<8x32xf32>
    %303 = vector.broadcast %282 : vector<1x32xf32> to vector<8x32xf32>
    %304 = arith.mulf %302, %303 : vector<8x32xf32>
    %305 = vector.broadcast %284 : vector<1x32xf32> to vector<8x32xf32>
    %306 = arith.addf %304, %305 : vector<8x32xf32>
    %307 = arith.truncf %306 : vector<8x32xf32> to vector<8x32xbf16>
    %c1_137 = arith.constant 1 : index
    %c0_138 = arith.constant 0 : index
    %c0_139 = arith.constant 0 : index
    %308 = vector.load %arg12[%c1_137, %c0_138, %c0_139] : memref<2x32x32xbf16, #tpu.memory_space<vmem>>, vector<1x32x32xbf16>
    %309 = vector.shape_cast %308 : vector<1x32x32xbf16> to vector<32x32xbf16>
    %cst_140 = arith.constant dense<0.000000e+00> : vector<8x32xf32>
    %310 = tpu.matmul %307, %309, %cst_140 {dimension_numbers = #tpu.dot_dimension_numbers<[1], [0], [0], [1], [0, 0, 1, 1], [], []>} : vector<8x32xbf16>, vector<32x32xbf16>, vector<8x32xf32> -> vector<8x32xf32>
    %c1_141 = arith.constant 1 : index
    %c0_142 = arith.constant 0 : index
    %c0_143 = arith.constant 0 : index
    %311 = vector.load %arg13[%c1_141, %c0_142, %c0_143] : memref<2x1x32xf32, #tpu.memory_space<vmem>>, vector<1x1x32xf32>
    %312 = vector.shape_cast %311 : vector<1x1x32xf32> to vector<1x32xf32>
    %313 = vector.broadcast %312 : vector<1x32xf32> to vector<8x32xf32>
    %314 = arith.addf %310, %313 : vector<8x32xf32>
    %cst_144 = arith.constant 0.353553385 : f32
    %315 = vector.broadcast %cst_144 : f32 to vector<8x32xf32>
    %316 = arith.mulf %314, %315 : vector<8x32xf32>
    %c1_145 = arith.constant 1 : index
    %c0_146 = arith.constant 0 : index
    %c0_147 = arith.constant 0 : index
    %317 = vector.load %arg14[%c1_145, %c0_146, %c0_147] : memref<2x32x32xbf16, #tpu.memory_space<vmem>>, vector<1x32x32xbf16>
    %318 = vector.shape_cast %317 : vector<1x32x32xbf16> to vector<32x32xbf16>
    %cst_148 = arith.constant dense<0.000000e+00> : vector<8x32xf32>
    %319 = tpu.matmul %307, %318, %cst_148 {dimension_numbers = #tpu.dot_dimension_numbers<[1], [0], [0], [1], [0, 0, 1, 1], [], []>} : vector<8x32xbf16>, vector<32x32xbf16>, vector<8x32xf32> -> vector<8x32xf32>
    %c1_149 = arith.constant 1 : index
    %c0_150 = arith.constant 0 : index
    %c0_151 = arith.constant 0 : index
    %320 = vector.load %arg15[%c1_149, %c0_150, %c0_151] : memref<2x32x32xbf16, #tpu.memory_space<vmem>>, vector<1x32x32xbf16>
    %321 = vector.shape_cast %320 : vector<1x32x32xbf16> to vector<32x32xbf16>
    %cst_152 = arith.constant dense<0.000000e+00> : vector<8x32xf32>
    %322 = tpu.matmul %307, %321, %cst_152 {dimension_numbers = #tpu.dot_dimension_numbers<[1], [0], [0], [1], [0, 0, 1, 1], [], []>} : vector<8x32xbf16>, vector<32x32xbf16>, vector<8x32xf32> -> vector<8x32xf32>
    %c1_153 = arith.constant 1 : index
    %c0_154 = arith.constant 0 : index
    %c0_155 = arith.constant 0 : index
    %323 = vector.load %arg16[%c1_153, %c0_154, %c0_155] : memref<2x1x32xf32, #tpu.memory_space<vmem>>, vector<1x1x32xf32>
    %324 = vector.shape_cast %323 : vector<1x1x32xf32> to vector<1x32xf32>
    %325 = vector.broadcast %324 : vector<1x32xf32> to vector<8x32xf32>
    %326 = arith.addf %322, %325 : vector<8x32xf32>
    %327 = vector.extract_strided_slice %316 {offsets = [0, 0], sizes = [8, 8], strides = [1, 1]} : vector<8x32xf32> to vector<8x8xf32>
    %328 = arith.truncf %327 : vector<8x8xf32> to vector<8x8xbf16>
    %329 = vector.extract_strided_slice %319 {offsets = [0, 0], sizes = [8, 8], strides = [1, 1]} : vector<8x32xf32> to vector<8x8xf32>
    %330 = arith.truncf %329 : vector<8x8xf32> to vector<8x8xbf16>
    %331 = vector.extract_strided_slice %326 {offsets = [0, 0], sizes = [8, 8], strides = [1, 1]} : vector<8x32xf32> to vector<8x8xf32>
    %332 = arith.truncf %331 : vector<8x8xf32> to vector<8x8xbf16>
    %cst_156 = arith.constant dense<0.000000e+00> : vector<8x8xf32>
    %333 = tpu.matmul %328, %330, %cst_156 {dimension_numbers = #tpu.dot_dimension_numbers<[1], [1], [0], [0], [0, 0, 1, 0], [], []>} : vector<8x8xbf16>, vector<8x8xbf16>, vector<8x8xf32> -> vector<8x8xf32>
    %cst_157 = arith.constant dense<0xFF800000> : vector<8xf32>
    %334 = vector.multi_reduction <maximumf>, %333, %cst_157 [1] : vector<8x8xf32> to vector<8xf32>
    %335 = vector.shape_cast %334 : vector<8xf32> to vector<8x1xf32>
    %336 = vector.broadcast %335 : vector<8x1xf32> to vector<8x8xf32>
    %337 = arith.subf %333, %336 : vector<8x8xf32>
    %338 = math.exp %337 : vector<8x8xf32>
    %cst_158 = arith.constant dense<0.000000e+00> : vector<8xf32>
    %339 = vector.multi_reduction <add>, %338, %cst_158 [1] : vector<8x8xf32> to vector<8xf32>
    %340 = vector.shape_cast %339 : vector<8xf32> to vector<8x1xf32>
    %341 = tpu.reciprocal %340 {approx = true} : vector<8x1xf32> -> vector<8x1xf32>
    %342 = vector.broadcast %341 : vector<8x1xf32> to vector<8x8xf32>
    %343 = arith.mulf %338, %342 : vector<8x8xf32>
    %344 = arith.truncf %343 : vector<8x8xf32> to vector<8x8xbf16>
    %cst_159 = arith.constant dense<0.000000e+00> : vector<8x8xf32>
    %345 = tpu.matmul %344, %332, %cst_159 {dimension_numbers = #tpu.dot_dimension_numbers<[1], [0], [0], [1], [0, 0, 1, 1], [], []>} : vector<8x8xbf16>, vector<8x8xbf16>, vector<8x8xf32> -> vector<8x8xf32>
    %346 = vector.extract_strided_slice %316 {offsets = [0, 8], sizes = [8, 8], strides = [1, 1]} : vector<8x32xf32> to vector<8x8xf32>
    %347 = arith.truncf %346 : vector<8x8xf32> to vector<8x8xbf16>
    %348 = vector.extract_strided_slice %319 {offsets = [0, 8], sizes = [8, 8], strides = [1, 1]} : vector<8x32xf32> to vector<8x8xf32>
    %349 = arith.truncf %348 : vector<8x8xf32> to vector<8x8xbf16>
    %350 = vector.extract_strided_slice %326 {offsets = [0, 8], sizes = [8, 8], strides = [1, 1]} : vector<8x32xf32> to vector<8x8xf32>
    %351 = arith.truncf %350 : vector<8x8xf32> to vector<8x8xbf16>
    %cst_160 = arith.constant dense<0.000000e+00> : vector<8x8xf32>
    %352 = tpu.matmul %347, %349, %cst_160 {dimension_numbers = #tpu.dot_dimension_numbers<[1], [1], [0], [0], [0, 0, 1, 0], [], []>} : vector<8x8xbf16>, vector<8x8xbf16>, vector<8x8xf32> -> vector<8x8xf32>
    %cst_161 = arith.constant dense<0xFF800000> : vector<8xf32>
    %353 = vector.multi_reduction <maximumf>, %352, %cst_161 [1] : vector<8x8xf32> to vector<8xf32>
    %354 = vector.shape_cast %353 : vector<8xf32> to vector<8x1xf32>
    %355 = vector.broadcast %354 : vector<8x1xf32> to vector<8x8xf32>
    %356 = arith.subf %352, %355 : vector<8x8xf32>
    %357 = math.exp %356 : vector<8x8xf32>
    %cst_162 = arith.constant dense<0.000000e+00> : vector<8xf32>
    %358 = vector.multi_reduction <add>, %357, %cst_162 [1] : vector<8x8xf32> to vector<8xf32>
    %359 = vector.shape_cast %358 : vector<8xf32> to vector<8x1xf32>
    %360 = tpu.reciprocal %359 {approx = true} : vector<8x1xf32> -> vector<8x1xf32>
    %361 = vector.broadcast %360 : vector<8x1xf32> to vector<8x8xf32>
    %362 = arith.mulf %357, %361 : vector<8x8xf32>
    %363 = arith.truncf %362 : vector<8x8xf32> to vector<8x8xbf16>
    %cst_163 = arith.constant dense<0.000000e+00> : vector<8x8xf32>
    %364 = tpu.matmul %363, %351, %cst_163 {dimension_numbers = #tpu.dot_dimension_numbers<[1], [0], [0], [1], [0, 0, 1, 1], [], []>} : vector<8x8xbf16>, vector<8x8xbf16>, vector<8x8xf32> -> vector<8x8xf32>
    %365 = vector.extract_strided_slice %316 {offsets = [0, 16], sizes = [8, 8], strides = [1, 1]} : vector<8x32xf32> to vector<8x8xf32>
    %366 = arith.truncf %365 : vector<8x8xf32> to vector<8x8xbf16>
    %367 = vector.extract_strided_slice %319 {offsets = [0, 16], sizes = [8, 8], strides = [1, 1]} : vector<8x32xf32> to vector<8x8xf32>
    %368 = arith.truncf %367 : vector<8x8xf32> to vector<8x8xbf16>
    %369 = vector.extract_strided_slice %326 {offsets = [0, 16], sizes = [8, 8], strides = [1, 1]} : vector<8x32xf32> to vector<8x8xf32>
    %370 = arith.truncf %369 : vector<8x8xf32> to vector<8x8xbf16>
    %cst_164 = arith.constant dense<0.000000e+00> : vector<8x8xf32>
    %371 = tpu.matmul %366, %368, %cst_164 {dimension_numbers = #tpu.dot_dimension_numbers<[1], [1], [0], [0], [0, 0, 1, 0], [], []>} : vector<8x8xbf16>, vector<8x8xbf16>, vector<8x8xf32> -> vector<8x8xf32>
    %cst_165 = arith.constant dense<0xFF800000> : vector<8xf32>
    %372 = vector.multi_reduction <maximumf>, %371, %cst_165 [1] : vector<8x8xf32> to vector<8xf32>
    %373 = vector.shape_cast %372 : vector<8xf32> to vector<8x1xf32>
    %374 = vector.broadcast %373 : vector<8x1xf32> to vector<8x8xf32>
    %375 = arith.subf %371, %374 : vector<8x8xf32>
    %376 = math.exp %375 : vector<8x8xf32>
    %cst_166 = arith.constant dense<0.000000e+00> : vector<8xf32>
    %377 = vector.multi_reduction <add>, %376, %cst_166 [1] : vector<8x8xf32> to vector<8xf32>
    %378 = vector.shape_cast %377 : vector<8xf32> to vector<8x1xf32>
    %379 = tpu.reciprocal %378 {approx = true} : vector<8x1xf32> -> vector<8x1xf32>
    %380 = vector.broadcast %379 : vector<8x1xf32> to vector<8x8xf32>
    %381 = arith.mulf %376, %380 : vector<8x8xf32>
    %382 = arith.truncf %381 : vector<8x8xf32> to vector<8x8xbf16>
    %cst_167 = arith.constant dense<0.000000e+00> : vector<8x8xf32>
    %383 = tpu.matmul %382, %370, %cst_167 {dimension_numbers = #tpu.dot_dimension_numbers<[1], [0], [0], [1], [0, 0, 1, 1], [], []>} : vector<8x8xbf16>, vector<8x8xbf16>, vector<8x8xf32> -> vector<8x8xf32>
    %384 = vector.extract_strided_slice %316 {offsets = [0, 24], sizes = [8, 8], strides = [1, 1]} : vector<8x32xf32> to vector<8x8xf32>
    %385 = arith.truncf %384 : vector<8x8xf32> to vector<8x8xbf16>
    %386 = vector.extract_strided_slice %319 {offsets = [0, 24], sizes = [8, 8], strides = [1, 1]} : vector<8x32xf32> to vector<8x8xf32>
    %387 = arith.truncf %386 : vector<8x8xf32> to vector<8x8xbf16>
    %388 = vector.extract_strided_slice %326 {offsets = [0, 24], sizes = [8, 8], strides = [1, 1]} : vector<8x32xf32> to vector<8x8xf32>
    %389 = arith.truncf %388 : vector<8x8xf32> to vector<8x8xbf16>
    %cst_168 = arith.constant dense<0.000000e+00> : vector<8x8xf32>
    %390 = tpu.matmul %385, %387, %cst_168 {dimension_numbers = #tpu.dot_dimension_numbers<[1], [1], [0], [0], [0, 0, 1, 0], [], []>} : vector<8x8xbf16>, vector<8x8xbf16>, vector<8x8xf32> -> vector<8x8xf32>
    %cst_169 = arith.constant dense<0xFF800000> : vector<8xf32>
    %391 = vector.multi_reduction <maximumf>, %390, %cst_169 [1] : vector<8x8xf32> to vector<8xf32>
    %392 = vector.shape_cast %391 : vector<8xf32> to vector<8x1xf32>
    %393 = vector.broadcast %392 : vector<8x1xf32> to vector<8x8xf32>
    %394 = arith.subf %390, %393 : vector<8x8xf32>
    %395 = math.exp %394 : vector<8x8xf32>
    %cst_170 = arith.constant dense<0.000000e+00> : vector<8xf32>
    %396 = vector.multi_reduction <add>, %395, %cst_170 [1] : vector<8x8xf32> to vector<8xf32>
    %397 = vector.shape_cast %396 : vector<8xf32> to vector<8x1xf32>
    %398 = tpu.reciprocal %397 {approx = true} : vector<8x1xf32> -> vector<8x1xf32>
    %399 = vector.broadcast %398 : vector<8x1xf32> to vector<8x8xf32>
    %400 = arith.mulf %395, %399 : vector<8x8xf32>
    %401 = arith.truncf %400 : vector<8x8xf32> to vector<8x8xbf16>
    %cst_171 = arith.constant dense<0.000000e+00> : vector<8x8xf32>
    %402 = tpu.matmul %401, %389, %cst_171 {dimension_numbers = #tpu.dot_dimension_numbers<[1], [0], [0], [1], [0, 0, 1, 1], [], []>} : vector<8x8xbf16>, vector<8x8xbf16>, vector<8x8xf32> -> vector<8x8xf32>
    %403 = tpu.concatenate %345, %364, %383, %402 in 1 : vector<8x8xf32>, vector<8x8xf32>, vector<8x8xf32>, vector<8x8xf32> -> vector<8x32xf32>
    %404 = arith.truncf %403 : vector<8x32xf32> to vector<8x32xbf16>
    %c1_172 = arith.constant 1 : index
    %c0_173 = arith.constant 0 : index
    %c0_174 = arith.constant 0 : index
    %405 = vector.load %arg17[%c1_172, %c0_173, %c0_174] : memref<2x32x32xbf16, #tpu.memory_space<vmem>>, vector<1x32x32xbf16>
    %406 = vector.shape_cast %405 : vector<1x32x32xbf16> to vector<32x32xbf16>
    %cst_175 = arith.constant dense<0.000000e+00> : vector<8x32xf32>
    %407 = tpu.matmul %404, %406, %cst_175 {dimension_numbers = #tpu.dot_dimension_numbers<[1], [0], [0], [1], [0, 0, 1, 1], [], []>} : vector<8x32xbf16>, vector<32x32xbf16>, vector<8x32xf32> -> vector<8x32xf32>
    %c1_176 = arith.constant 1 : index
    %c0_177 = arith.constant 0 : index
    %c0_178 = arith.constant 0 : index
    %408 = vector.load %arg18[%c1_176, %c0_177, %c0_178] : memref<2x1x32xf32, #tpu.memory_space<vmem>>, vector<1x1x32xf32>
    %409 = vector.shape_cast %408 : vector<1x1x32xf32> to vector<1x32xf32>
    %410 = vector.broadcast %409 : vector<1x32xf32> to vector<8x32xf32>
    %411 = arith.addf %407, %410 : vector<8x32xf32>
    %412 = arith.addf %280, %411 : vector<8x32xf32>
    %c1_179 = arith.constant 1 : index
    %c0_180 = arith.constant 0 : index
    %c0_181 = arith.constant 0 : index
    %413 = vector.load %arg19[%c1_179, %c0_180, %c0_181] : memref<2x1x32xf32, #tpu.memory_space<vmem>>, vector<1x1x32xf32>
    %414 = vector.shape_cast %413 : vector<1x1x32xf32> to vector<1x32xf32>
    %c1_182 = arith.constant 1 : index
    %c0_183 = arith.constant 0 : index
    %c0_184 = arith.constant 0 : index
    %415 = vector.load %arg20[%c1_182, %c0_183, %c0_184] : memref<2x1x32xf32, #tpu.memory_space<vmem>>, vector<1x1x32xf32>
    %416 = vector.shape_cast %415 : vector<1x1x32xf32> to vector<1x32xf32>
    %cst_185 = arith.constant dense<0.000000e+00> : vector<8xf32>
    %417 = vector.multi_reduction <add>, %412, %cst_185 [1] : vector<8x32xf32> to vector<8xf32>
    %418 = vector.shape_cast %417 : vector<8xf32> to vector<8x1xf32>
    %cst_186 = arith.constant 3.200000e+01 : f32
    %419 = vector.broadcast %cst_186 : f32 to vector<8x1xf32>
    %420 = arith.divf %418, %419 : vector<8x1xf32>
    %421 = vector.broadcast %420 : vector<8x1xf32> to vector<8x32xf32>
    %422 = arith.subf %412, %421 : vector<8x32xf32>
    %423 = arith.mulf %422, %422 : vector<8x32xf32>
    %cst_187 = arith.constant dense<0.000000e+00> : vector<8xf32>
    %424 = vector.multi_reduction <add>, %423, %cst_187 [1] : vector<8x32xf32> to vector<8xf32>
    %425 = vector.shape_cast %424 : vector<8xf32> to vector<8x1xf32>
    %cst_188 = arith.constant 3.200000e+01 : f32
    %426 = vector.broadcast %cst_188 : f32 to vector<8x1xf32>
    %427 = arith.divf %425, %426 : vector<8x1xf32>
    %428 = vector.broadcast %420 : vector<8x1xf32> to vector<8x32xf32>
    %429 = arith.subf %412, %428 : vector<8x32xf32>
    %cst_189 = arith.constant 9.99999974E-6 : f32
    %430 = vector.broadcast %cst_189 : f32 to vector<8x1xf32>
    %431 = arith.addf %427, %430 : vector<8x1xf32>
    %432 = math.rsqrt %431 : vector<8x1xf32>
    %433 = vector.broadcast %432 : vector<8x1xf32> to vector<8x32xf32>
    %434 = arith.mulf %429, %433 : vector<8x32xf32>
    %435 = vector.broadcast %414 : vector<1x32xf32> to vector<8x32xf32>
    %436 = arith.mulf %434, %435 : vector<8x32xf32>
    %437 = vector.broadcast %416 : vector<1x32xf32> to vector<8x32xf32>
    %438 = arith.addf %436, %437 : vector<8x32xf32>
    %439 = arith.truncf %438 : vector<8x32xf32> to vector<8x32xbf16>
    %c1_190 = arith.constant 1 : index
    %c0_191 = arith.constant 0 : index
    %c0_192 = arith.constant 0 : index
    %440 = vector.load %arg21[%c1_190, %c0_191, %c0_192] : memref<2x32x64xbf16, #tpu.memory_space<vmem>>, vector<1x32x64xbf16>
    %441 = vector.shape_cast %440 : vector<1x32x64xbf16> to vector<32x64xbf16>
    %cst_193 = arith.constant dense<0.000000e+00> : vector<8x64xf32>
    %442 = tpu.matmul %439, %441, %cst_193 {dimension_numbers = #tpu.dot_dimension_numbers<[1], [0], [0], [1], [0, 0, 1, 1], [], []>} : vector<8x32xbf16>, vector<32x64xbf16>, vector<8x64xf32> -> vector<8x64xf32>
    %c1_194 = arith.constant 1 : index
    %c0_195 = arith.constant 0 : index
    %c0_196 = arith.constant 0 : index
    %443 = vector.load %arg22[%c1_194, %c0_195, %c0_196] : memref<2x1x64xf32, #tpu.memory_space<vmem>>, vector<1x1x64xf32>
    %444 = vector.shape_cast %443 : vector<1x1x64xf32> to vector<1x64xf32>
    %445 = vector.broadcast %444 : vector<1x64xf32> to vector<8x64xf32>
    %446 = arith.addf %442, %445 : vector<8x64xf32>
    %cst_197 = arith.constant 5.000000e-01 : f32
    %447 = vector.broadcast %cst_197 : f32 to vector<8x64xf32>
    %448 = arith.mulf %447, %446 : vector<8x64xf32>
    %cst_198 = arith.constant 0.707106769 : f32
    %449 = vector.broadcast %cst_198 : f32 to vector<8x64xf32>
    %450 = arith.mulf %446, %449 : vector<8x64xf32>
    %451 = math.erf %450 : vector<8x64xf32>
    %cst_199 = arith.constant 1.000000e+00 : f32
    %452 = vector.broadcast %cst_199 : f32 to vector<8x64xf32>
    %453 = arith.addf %452, %451 : vector<8x64xf32>
    %454 = arith.mulf %448, %453 : vector<8x64xf32>
    %455 = arith.truncf %454 : vector<8x64xf32> to vector<8x64xbf16>
    %c1_200 = arith.constant 1 : index
    %c0_201 = arith.constant 0 : index
    %c0_202 = arith.constant 0 : index
    %456 = vector.load %arg23[%c1_200, %c0_201, %c0_202] : memref<2x64x32xbf16, #tpu.memory_space<vmem>>, vector<1x64x32xbf16>
    %457 = vector.shape_cast %456 : vector<1x64x32xbf16> to vector<64x32xbf16>
    %cst_203 = arith.constant dense<0.000000e+00> : vector<8x32xf32>
    %458 = tpu.matmul %455, %457, %cst_203 {dimension_numbers = #tpu.dot_dimension_numbers<[1], [0], [0], [1], [0, 0, 1, 1], [], []>} : vector<8x64xbf16>, vector<64x32xbf16>, vector<8x32xf32> -> vector<8x32xf32>
    %c1_204 = arith.constant 1 : index
    %c0_205 = arith.constant 0 : index
    %c0_206 = arith.constant 0 : index
    %459 = vector.load %arg24[%c1_204, %c0_205, %c0_206] : memref<2x1x32xf32, #tpu.memory_space<vmem>>, vector<1x1x32xf32>
    %460 = vector.shape_cast %459 : vector<1x1x32xf32> to vector<1x32xf32>
    %461 = vector.broadcast %460 : vector<1x32xf32> to vector<8x32xf32>
    %462 = arith.addf %458, %461 : vector<8x32xf32>
    %463 = arith.addf %412, %462 : vector<8x32xf32>
    %c0_207 = arith.constant 0 : index
    %c0_208 = arith.constant 0 : index
    %464 = vector.load %arg25[%c0_207, %c0_208] : memref<1x32xf32, #tpu.memory_space<vmem>>, vector<1x32xf32>
    %c0_209 = arith.constant 0 : index
    %c0_210 = arith.constant 0 : index
    %465 = vector.load %arg26[%c0_209, %c0_210] : memref<1x32xf32, #tpu.memory_space<vmem>>, vector<1x32xf32>
    %cst_211 = arith.constant dense<0.000000e+00> : vector<8xf32>
    %466 = vector.multi_reduction <add>, %463, %cst_211 [1] : vector<8x32xf32> to vector<8xf32>
    %467 = vector.shape_cast %466 : vector<8xf32> to vector<8x1xf32>
    %cst_212 = arith.constant 3.200000e+01 : f32
    %468 = vector.broadcast %cst_212 : f32 to vector<8x1xf32>
    %469 = arith.divf %467, %468 : vector<8x1xf32>
    %470 = vector.broadcast %469 : vector<8x1xf32> to vector<8x32xf32>
    %471 = arith.subf %463, %470 : vector<8x32xf32>
    %472 = arith.mulf %471, %471 : vector<8x32xf32>
    %cst_213 = arith.constant dense<0.000000e+00> : vector<8xf32>
    %473 = vector.multi_reduction <add>, %472, %cst_213 [1] : vector<8x32xf32> to vector<8xf32>
    %474 = vector.shape_cast %473 : vector<8xf32> to vector<8x1xf32>
    %cst_214 = arith.constant 3.200000e+01 : f32
    %475 = vector.broadcast %cst_214 : f32 to vector<8x1xf32>
    %476 = arith.divf %474, %475 : vector<8x1xf32>
    %477 = vector.broadcast %469 : vector<8x1xf32> to vector<8x32xf32>
    %478 = arith.subf %463, %477 : vector<8x32xf32>
    %cst_215 = arith.constant 9.99999974E-6 : f32
    %479 = vector.broadcast %cst_215 : f32 to vector<8x1xf32>
    %480 = arith.addf %476, %479 : vector<8x1xf32>
    %481 = math.rsqrt %480 : vector<8x1xf32>
    %482 = vector.broadcast %481 : vector<8x1xf32> to vector<8x32xf32>
    %483 = arith.mulf %478, %482 : vector<8x32xf32>
    %484 = vector.broadcast %464 : vector<1x32xf32> to vector<8x32xf32>
    %485 = arith.mulf %483, %484 : vector<8x32xf32>
    %486 = vector.broadcast %465 : vector<1x32xf32> to vector<8x32xf32>
    %487 = arith.addf %485, %486 : vector<8x32xf32>
    %c0_216 = arith.constant 0 : index
    %c0_217 = arith.constant 0 : index
    %c0_218 = arith.constant 0 : index
    %488 = vector.load %arg27[%c0_216, %c0_217, %c0_218] : memref<1x8x32xf32, #tpu.memory_space<vmem>>, vector<1x8x32xf32>
    %489 = vector.shape_cast %488 : vector<1x8x32xf32> to vector<8x32xf32>
    %490 = vector.shape_cast %487 : vector<8x32xf32> to vector<1x8x32xf32>
    tpu.vector_store %arg27[%c0_216, %c0_217, %c0_218], %490 {strides = array<i32>} : memref<1x8x32xf32, #tpu.memory_space<vmem>>, vector<1x8x32xf32>,
    return
  }
  func.func @transform_0(%arg0: i32) -> (i32, i32, i32) {
    %c0_i32 = arith.constant 0 : i32
    %c0_i32_0 = arith.constant 0 : i32
    %c0_i32_1 = arith.constant 0 : i32
    return %arg0, %c0_i32, %c0_i32_0 : i32, i32, i32
  }
  func.func @transform_1(%arg0: i32) -> (i32, i32) {
    %c0_i32 = arith.constant 0 : i32
    %c0_i32_0 = arith.constant 0 : i32
    %c0_i32_1 = arith.constant 0 : i32
    return %c0_i32, %c0_i32_0 : i32, i32
  }
  func.func @transform_2(%arg0: i32) -> (i32, i32) {
    %c0_i32 = arith.constant 0 : i32
    %c0_i32_0 = arith.constant 0 : i32
    %c0_i32_1 = arith.constant 0 : i32
    return %c0_i32, %c0_i32_0 : i32, i32
  }
  func.func @transform_3(%arg0: i32) -> (i32, i32) {
    %c0_i32 = arith.constant 0 : i32
    %c0_i32_0 = arith.constant 0 : i32
    %c0_i32_1 = arith.constant 0 : i32
    return %c0_i32, %c0_i32_0 : i32, i32
  }
  func.func @transform_4(%arg0: i32) -> (i32, i32) {
    %c0_i32 = arith.constant 0 : i32
    %c0_i32_0 = arith.constant 0 : i32
    %c0_i32_1 = arith.constant 0 : i32
    return %c0_i32, %c0_i32_0 : i32, i32
  }
  func.func @transform_5(%arg0: i32) -> (i32, i32, i32) {
    %c0_i32 = arith.constant 0 : i32
    %c0_i32_0 = arith.constant 0 : i32
    %c0_i32_1 = arith.constant 0 : i32
    %c0_i32_2 = arith.constant 0 : i32
    return %c0_i32, %c0_i32_0, %c0_i32_1 : i32, i32, i32
  }
  func.func @transform_6(%arg0: i32) -> (i32, i32) {
    %c0_i32 = arith.constant 0 : i32
    %c0_i32_0 = arith.constant 0 : i32
    %c0_i32_1 = arith.constant 0 : i32
    return %c0_i32, %c0_i32_0 : i32, i32
  }
  func.func @transform_7(%arg0: i32) -> (i32, i32) {
    %c0_i32 = arith.constant 0 : i32
    %c0_i32_0 = arith.constant 0 : i32
    %c0_i32_1 = arith.constant 0 : i32
    return %c0_i32, %c0_i32_0 : i32, i32
  }
  func.func @transform_8(%arg0: i32) -> (i32, i32) {
    %c0_i32 = arith.constant 0 : i32
    %c0_i32_0 = arith.constant 0 : i32
    %c0_i32_1 = arith.constant 0 : i32
    return %c0_i32, %c0_i32_0 : i32, i32
  }
  func.func @transform_9(%arg0: i32) -> (i32, i32, i32) {
    %c0_i32 = arith.constant 0 : i32
    %c0_i32_0 = arith.constant 0 : i32
    %c0_i32_1 = arith.constant 0 : i32
    %c0_i32_2 = arith.constant 0 : i32
    return %c0_i32, %c0_i32_0, %c0_i32_1 : i32, i32, i32
  }
  func.func @transform_10(%arg0: i32) -> (i32, i32, i32) {
    %c0_i32 = arith.constant 0 : i32
    %c0_i32_0 = arith.constant 0 : i32
    %c0_i32_1 = arith.constant 0 : i32
    %c0_i32_2 = arith.constant 0 : i32
    return %c0_i32, %c0_i32_0, %c0_i32_1 : i32, i32, i32
  }
  func.func @transform_11(%arg0: i32) -> (i32, i32, i32) {
    %c0_i32 = arith.constant 0 : i32
    %c0_i32_0 = arith.constant 0 : i32
    %c0_i32_1 = arith.constant 0 : i32
    %c0_i32_2 = arith.constant 0 : i32
    return %c0_i32, %c0_i32_0, %c0_i32_1 : i32, i32, i32
  }
  func.func @transform_12(%arg0: i32) -> (i32, i32, i32) {
    %c0_i32 = arith.constant 0 : i32
    %c0_i32_0 = arith.constant 0 : i32
    %c0_i32_1 = arith.constant 0 : i32
    %c0_i32_2 = arith.constant 0 : i32
    return %c0_i32, %c0_i32_0, %c0_i32_1 : i32, i32, i32
  }
  func.func @transform_13(%arg0: i32) -> (i32, i32, i32) {
    %c0_i32 = arith.constant 0 : i32
    %c0_i32_0 = arith.constant 0 : i32
    %c0_i32_1 = arith.constant 0 : i32
    %c0_i32_2 = arith.constant 0 : i32
    return %c0_i32, %c0_i32_0, %c0_i32_1 : i32, i32, i32
  }
  func.func @transform_14(%arg0: i32) -> (i32, i32, i32) {
    %c0_i32 = arith.constant 0 : i32
    %c0_i32_0 = arith.constant 0 : i32
    %c0_i32_1 = arith.constant 0 : i32
    %c0_i32_2 = arith.constant 0 : i32
    return %c0_i32, %c0_i32_0, %c0_i32_1 : i32, i32, i32
  }
  func.func @transform_15(%arg0: i32) -> (i32, i32, i32) {
    %c0_i32 = arith.constant 0 : i32
    %c0_i32_0 = arith.constant 0 : i32
    %c0_i32_1 = arith.constant 0 : i32
    %c0_i32_2 = arith.constant 0 : i32
    return %c0_i32, %c0_i32_0, %c0_i32_1 : i32, i32, i32
  }
  func.func @transform_16(%arg0: i32) -> (i32, i32, i32) {
    %c0_i32 = arith.constant 0 : i32
    %c0_i32_0 = arith.constant 0 : i32
    %c0_i32_1 = arith.constant 0 : i32
    %c0_i32_2 = arith.constant 0 : i32
    return %c0_i32, %c0_i32_0, %c0_i32_1 : i32, i32, i32
  }
  func.func @transform_17(%arg0: i32) -> (i32, i32, i32) {
    %c0_i32 = arith.constant 0 : i32
    %c0_i32_0 = arith.constant 0 : i32
    %c0_i32_1 = arith.constant 0 : i32
    %c0_i32_2 = arith.constant 0 : i32
    return %c0_i32, %c0_i32_0, %c0_i32_1 : i32, i32, i32
  }
  func.func @transform_18(%arg0: i32) -> (i32, i32, i32) {
    %c0_i32 = arith.constant 0 : i32
    %c0_i32_0 = arith.constant 0 : i32
    %c0_i32_1 = arith.constant 0 : i32
    %c0_i32_2 = arith.constant 0 : i32
    return %c0_i32, %c0_i32_0, %c0_i32_1 : i32, i32, i32
  }
  func.func @transform_19(%arg0: i32) -> (i32, i32, i32) {
    %c0_i32 = arith.constant 0 : i32
    %c0_i32_0 = arith.constant 0 : i32
    %c0_i32_1 = arith.constant 0 : i32
    %c0_i32_2 = arith.constant 0 : i32
    return %c0_i32, %c0_i32_0, %c0_i32_1 : i32, i32, i32
  }
  func.func @transform_20(%arg0: i32) -> (i32, i32, i32) {
    %c0_i32 = arith.constant 0 : i32
    %c0_i32_0 = arith.constant 0 : i32
    %c0_i32_1 = arith.constant 0 : i32
    %c0_i32_2 = arith.constant 0 : i32
    return %c0_i32, %c0_i32_0, %c0_i32_1 : i32, i32, i32
  }
  func.func @transform_21(%arg0: i32) -> (i32, i32, i32) {
    %c0_i32 = arith.constant 0 : i32
    %c0_i32_0 = arith.constant 0 : i32
    %c0_i32_1 = arith.constant 0 : i32
    %c0_i32_2 = arith.constant 0 : i32
    return %c0_i32, %c0_i32_0, %c0_i32_1 : i32, i32, i32
  }
  func.func @transform_22(%arg0: i32) -> (i32, i32, i32) {
    %c0_i32 = arith.constant 0 : i32
    %c0_i32_0 = arith.constant 0 : i32
    %c0_i32_1 = arith.constant 0 : i32
    %c0_i32_2 = arith.constant 0 : i32
    return %c0_i32, %c0_i32_0, %c0_i32_1 : i32, i32, i32
  }
  func.func @transform_23(%arg0: i32) -> (i32, i32, i32) {
    %c0_i32 = arith.constant 0 : i32
    %c0_i32_0 = arith.constant 0 : i32
    %c0_i32_1 = arith.constant 0 : i32
    %c0_i32_2 = arith.constant 0 : i32
    return %c0_i32, %c0_i32_0, %c0_i32_1 : i32, i32, i32
  }
  func.func @transform_24(%arg0: i32) -> (i32, i32) {
    %c0_i32 = arith.constant 0 : i32
    %c0_i32_0 = arith.constant 0 : i32
    %c0_i32_1 = arith.constant 0 : i32
    return %c0_i32, %c0_i32_0 : i32, i32
  }
  func.func @transform_25(%arg0: i32) -> (i32, i32) {
    %c0_i32 = arith.constant 0 : i32
    %c0_i32_0 = arith.constant 0 : i32
    %c0_i32_1 = arith.constant 0 : i32
    return %c0_i32, %c0_i32_0 : i32, i32
  }
  func.func @transform_26(%arg0: i32) -> (i32, i32, i32) {
    %c0_i32 = arith.constant 0 : i32
    %c0_i32_0 = arith.constant 0 : i32
    %c0_i32_1 = arith.constant 0 : i32
    return %arg0, %c0_i32, %c0_i32_0 : i32, i32, i32
  }
}

</mosaic_0001>

<bundles_post_ra>
// kernel: whisper_forward.1
= control target key start
LH: loop header
LB: loop body
LE: loop exit
PB: predicated region body
PF: predicated region fallthrough
CT: control target
= control target key end

     0   :  { %s3010_s27 = smov 0   ;;  %s3389_s0 = inlined_call_operand.vmem [shape: f32[2,16,32], index: 0, kind: input, shape index: {}]   ;;  %s3390_s1 = inlined_call_operand.vmem [shape: bf16[32,34], index: 1, kind: input, shape index: {}]   ;;  %s3391_s2 = inlined_call_operand.vmem [shape: bf16[17,8], index: 2, kind: input, shape index: {}]   ;;  %s3392_s3 = inlined_call_operand.vmem [shape: bf16[8,96], index: 3, kind: input, shape index: {}]   ;;  %s3393_s4 = inlined_call_operand.vmem [shape: f32[1,32], index: 4, kind: input, shape index: {}]   ;;  %s3394_s5 = inlined_call_operand.vmem [shape: bf16[3,8,16], index: 5, kind: input, shape index: {}]   ;;  %s3395_s6 = inlined_call_operand.vmem [shape: bf16[32,96], index: 6, kind: input, shape index: {}]   ;;  %s3396_s7 = inlined_call_operand.vmem [shape: f32[1,32], index: 7, kind: input, shape index: {}]   ;;  %s3397_s8 = inlined_call_operand.vmem [shape: f32[8,32], index: 8, kind: input, shape index: {}]   ;;  %s3398_s9 = inlined_call_operand.vmem [shape: f32[2,1,32], index: 9, kind: input, shape index: {}]   ;;  %s3399_s10 = inlined_call_operand.vmem [shape: f32[2,1,32], index: 10, kind: input, shape index: {}]   ;;  %s3400_s11 = inlined_call_operand.vmem [shape: bf16[2,32,32], index: 11, kind: input, shape index: {}]   ;;  %s3401_s12 = inlined_call_operand.vmem [shape: f32[2,1,32], index: 12, kind: input, shape index: {}]   ;;  %s3402_s13 = inlined_call_operand.vmem [shape: bf16[2,32,32], index: 13, kind: input, shape index: {}]   ;;  %s3403_s14 = inlined_call_operand.vmem [shape: bf16[2,32,32], index: 14, kind: input, shape index: {}]   ;;  %s3404_s15 = inlined_call_operand.vmem [shape: f32[2,1,32], index: 15, kind: input, shape index: {}]   ;;  %s3405_s16 = inlined_call_operand.vmem [shape: bf16[2,32,32], index: 16, kind: input, shape index: {}]   ;;  %s3406_s17 = inlined_call_operand.vmem [shape: f32[2,1,32], index: 17, kind: input, shape index: {}]   ;;  %s3407_s18 = inlined_call_operand.vmem [shape: f32[2,1,32], index: 18, kind: input, shape index: {}]   ;;  %s3408_s19 = inlined_call_operand.vmem [shape: f32[2,1,32], index: 19, kind: input, shape index: {}]   ;;  %s3409_s20 = inlined_call_operand.vmem [shape: bf16[2,32,64], index: 20, kind: input, shape index: {}]   ;;  %s3410_s21 = inlined_call_operand.vmem [shape: f32[2,1,64], index: 21, kind: input, shape index: {}]   ;;  %s3411_s22 = inlined_call_operand.vmem [shape: bf16[2,64,32], index: 22, kind: input, shape index: {}]   ;;  %s3412_s23 = inlined_call_operand.vmem [shape: f32[2,1,32], index: 23, kind: input, shape index: {}]   ;;  %s3413_s24 = inlined_call_operand.vmem [shape: f32[1,32], index: 24, kind: input, shape index: {}]   ;;  %s3414_s25 = inlined_call_operand.vmem [shape: f32[1,32], index: 25, kind: input, shape index: {}]   ;;  %s3415_s26 = inlined_call_operand.vmem [shape: f32[2,8,32], index: 26, kind: output, shape index: {}]  }
   0x1   :  { %3434 = sst [smem:[#allocation2_spill]] %s3389_s0 }
   0x2   :  { %3435 = sst [smem:[#allocation3_spill]] %s3390_s1 }
   0x3   :  { %3436 = sst [smem:[#allocation4_spill]] %s3391_s2 }
   0x4   :  { %3437 = sst [smem:[#allocation5_spill]] %s3392_s3 }
   0x5   :  { %3438 = sst [smem:[#allocation6_spill]] %s3393_s4 }
   0x6   :  { %3439 = sst [smem:[#allocation7_spill]] %s3394_s5 }
   0x7   :  { %3440 = sst [smem:[#allocation8_spill]] %s3395_s6 }
   0x8   :  { %3441 = sst [smem:[#allocation9_spill]] %s3396_s7 }
   0x9   :  { %3442 = sst [smem:[#allocation10_spill]] %s3397_s8 }
   0xa   :  { %3443 = sst [smem:[#allocation11_spill]] %s3398_s9 }
   0xb   :  { %3444 = sst [smem:[#allocation12_spill]] %s3399_s10 }
   0xc LB: > { %s2497_s3 = sadd.s32 4294967295, %s2861_s27   ;;  %p2501_p0 = scmp.ge.s32.totalorder %s2861_s27, 1  ;;  %s2861_s27 = sphi %s3010_s27, %s36_s27  }
   0xd   : > { %p712_p1 = scmp.lt.s32.totalorder %s2861_s27, 3 }
   0xf   : > { %p713_p2 = pnand %p2501_p0, %p712_p1 }
  0x10   : > { %s3445_s8 = sld [smem:[#allocation3_spill]] (!%p713_p2)  ;;  %p781_p3 = scmp.lt.s32.totalorder (!%p713_p2), %s2497_s3, 1 }
  0x11   : > { %716 = sbr.rel (%p713_p2) target bundleno = 5666 (0x1622), region = 124  ;;  %s3446_s2 = sld [smem:[#allocation2_spill]] (!%p713_p2) }
  0x12   : > { %s2863_s10 = smov (!%p713_p2), 111   ;;  %s3447_s7 = sld [smem:[#allocation4_spill]] (!%p713_p2) }
  0x13   : > { %s3448_s9 = sld [smem:[#allocation5_spill]] (!%p713_p2)  ;;  %s3423_s29 = smov (!%p713_p2), 104  }
  0x14   : > { %s3449_s28 = sld [smem:[#allocation6_spill]] (!%p713_p2)  ;;  %s3428_s6 = smov (!%p713_p2), 16  }
  0x15   : > { %s3451_s1 = sld [smem:[#allocation7_spill]] (!%p713_p2)  ;;  %s3456_s4 = smov (!%p713_p2), 112  }
  0x16   : > { %v2721_v0 = vld [vmem:[%s3445_s8 + $0x8] sm:$0xff]  ;;  %v2720_v1 = vld [vmem:[%s3445_s8] sm:$0xff]  ;;  %s3463_s3 = smov (!%p781_p3, %s2497_s3), 1  ;;  %vm810_vm0 = vcmask 261120   ;;  %vm857_vm1 = vcmask 1040384   ;;  %v2864_v12 = vmov 0   ;;  %v908_v53 = vlaneseq }
  0x17   : > { %820 = vmatpush.bf16.msra.mxu0 %v2721_v0  ;;  %s2719_s0 = sshll.u32 %s3463_s3, 4  ;;  %v859_v13 = vsel %vm857_vm1, 65535, %v2864_v12  ;;  %vm853_vm2 = vcmask 138240   ;;  %vm885_vm3 = vcmask 64512   ;;  %vm916_vm4 = vcmask 1043456  }
  0x18   : > { %s785_s5 = scalar_lea.vmem %s3446_s2, %s2719_s0  ;;  %v843_v9 = vld [vmem:[%s3447_s7 + $0x8] sm:$0x1]  ;;  %v2722_v15 = vld [vmem:[%s3447_s7] sm:$0xff]  ;;  %v909_v54 = vshrl.u32 %v908_v53, 7  ;;  %s3450_s0 = sld [smem:[#allocation8_spill]] }
  0x19   : > { %v791_v2 = vld [vmem:[%s785_s5] sm:$0xff]  ;;  %v792_v3 = vld [vmem:[%s785_s5 + $0x8] sm:$0xff]  ;;  %v849_v10 = vunpack.c.l.b16 %v843_v9  ;;  %s2865_s5 = smov 64   ;;  %s3458_s7 = smov 104  }
  0x1a   : > { %v793_v4 = vpack.c.bf16 %v792_v3, %v791_v2  ;;  %v912_v42 = vld [vmem:[%s3448_s9] sm:$0xf]  ;;  %vm936_vm5 = vcmp.lt.s32.totalorder %v909_v54, 1  ;;  %vm939_vm6 = vcmp.gt.s32.totalorder %v909_v54, 0  ;;  %v910_v62 = vadd.s32 8, %v909_v54  ;;  %s3454_s9 = sld [smem:[#allocation11_spill]] }
  0x1b   : > { %821 = vmatpush.bf16.msra.mxu0 %v2720_v1  ;;  %v851_v11 = vpack.c.b16 %v849_v10, %v849_v10  ;;  %v918_v43 = vsel %vm916_vm4, %v912_v42, 0  ;;  %vm967_vm7 = vcmp.lt.s32.totalorder %v909_v54, 7 }
  0x1c   : > { %927 = vmatpush.bf16.msra.mxu2 %v918_v43  ;;  %vm971_vm8 = vcmp.lt.s32.totalorder %v910_v62, 15 }
  0x1d   : > { %v861_v14 = vand.u32 %v859_v13, %v851_v11 }
  0x1e   : > { %2513 = vmatmul.msk.bf16.vlgmr.msra.gmra.mxu0 %vm810_vm0, %v793_v4 }
  0x1f   : > { %869 = vmatpush.bf16.msra.mxu1 %v861_v14 }
  0x23   : > { %870 = vmatpush.bf16.msra.mxu1 %v2722_v15 }
  0x9b   : > { %v823_v5 = vpop.f32.mrf.mxu0 }
  0x9c   : > { %v828_v6 = vmul.f32 %v823_v5, %v823_v5  ;;  %v2775_v5 = vld [vmem:[%s3449_s28] ss:$0 sm:$0xff]  ;;  %s3453_s28 = sld [smem:[#allocation10_spill]] }
  0x9e   : > { %832 = vrot.lane.b32.xlu0 %v828_v6, %s2863_s10 }
  0xa3   : > { %v825_v7 = vpop.f32.mrf.mxu0 }
  0xa4   : > { %v829_v8 = vmul.f32 %v825_v7, %v825_v7 }
  0xa6   : > { %834 = vrot.lane.b32.xlu0 %v829_v8, %s2863_s10  ;;  %s2866_s10 = smov 32  }
 0x110   : > { %v833_v16 = vpop.permute.xlu0 %832 }
 0x111   : > { %v838_v18 = vadd.f32 %v833_v16, %v828_v6 }
 0x118   : > { %v835_v17 = vpop.permute.xlu0 %834 }
 0x119   : > { %v839_v19 = vadd.f32 %v835_v17, %v829_v8 }
 0x11b   : > { %v840_v20 = vpack.c.bf16 %v839_v19, %v838_v18 }
 0x11d   : > { %2518 = vmatmul.msk.bf16.vlgmr.msra.gmra.mxu1 %vm853_vm2, %v840_v20  ;;  %vm1129_vm2 = vcmask 130048  }
 0x19a   : > { %v872_v21 = vpop.f32.mrf.mxu1 }
 0x19b   : > { %v877_v22 = vmax.f32 %v872_v21, 1e-10 }
 0x19d   : > { %2797 = vlog2.f32 %v877_v22 }
 0x1a2   : > { %v874_v23 = vpop.f32.mrf.mxu1 }
 0x1a3   : > { %v2798_v24 = vpop.eup %2797  ;;  %v878_v25 = vmax.f32 %v874_v23, 1e-10 }
 0x1a4   : > { %v880_v26 = vmul.f32 0.6931472, %v2798_v24 }
 0x1a5   : > { %2799 = vlog2.f32 %v878_v25 }
 0x1a6   : > { %v883_v27 = vmul.f32 0.4342945, %v880_v26 }
 0x1a8   : > { %v886_v28 = vsel %vm885_vm3, %v883_v27, -inf }
 0x1a9   : > { %887 = vmax.xlane.f32.xlu1 %v886_v28 }
 0x1ab   : > { %v2800_v29 = vpop.eup %2799 }
 0x1ac   : > { %v882_v30 = vmul.f32 0.6931472, %v2800_v29 }
 0x1ae   : > { %v884_v31 = vmul.f32 0.4342945, %v882_v30 }
 0x1b0   : > { %v889_v32 = vsel %vm885_vm3, %v884_v31, -inf }
 0x1b1   : > { %890 = vmax.xlane.f32.xlu1 %v889_v32 }
 0x21c   : > { %v888_v33 = vpop.xlane.xlu1 %887 }
 0x224   : > { %v891_v34 = vpop.xlane.xlu1 %890 }
 0x225   : > { %v892_v35 = vmax.f32 %v888_v33, %v891_v34 }
 0x227   : > { %v893_v36 = vrot.slane %v892_v35, 4 }
 0x229   : > { %v894_v37 = vmax.f32 %v892_v35, %v893_v36 }
 0x22b   : > { %v895_v38 = vrot.slane %v894_v37, 2 }
 0x22d   : > { %v896_v39 = vmax.f32 %v894_v37, %v895_v38 }
 0x22f   : > { %v897_v40 = vrot.slane %v896_v39, 1 }
 0x231   : > { %v898_v41 = vmax.f32 %v896_v39, %v897_v40 }
 0x233   : > { %2753 = vpush %v898_v41 }
 0x264   : > { %s2754_s30 = spop %2753 }
 0x265   : > { %s2519_s2 = sadd.f32 -8.0, %s2754_s30  ;;  %s3430_s30 = smov 112  }
 0x267   : > { %v901_v44 = vstv %s2519_s2  ;;  %s2867_s2 = smov 96  }
 0x268   : > { %v902_v45 = vmax.f32 %v883_v27, %v901_v44  ;;  %v903_v46 = vmax.f32 %v884_v31, %v901_v44 }
 0x26a   : > { %v904_v47 = vadd.f32 4.0, %v902_v45  ;;  %v905_v48 = vadd.f32 4.0, %v903_v46 }
 0x26c   : > { %v906_v49 = vmul.f32 0.25, %v904_v47  ;;  %v907_v50 = vmul.f32 0.25, %v905_v48 }
 0x26e   : > { %v911_v51 = vpack.c.bf16 %v907_v50, %v906_v49 }
 0x270   : > { %2520 = vmatmul.msk.bf16.vlgmr.msra.gmra.mxu2 %vm885_vm3, %v911_v51 }
 0x2f3   : > { %v929_v52 = vpop.f32.mrf.mxu2 }
 0x2f4   : > { %959 = vrot.lane.b32.xlu2 %v929_v52, %s2865_s5  ;;  %v934_v56 = vrot.slane %v929_v52, 7 }
 0x2fb   : > { %v931_v55 = vpop.f32.mrf.mxu2 }
 0x2fc   : > { %v935_v57 = vrot.slane %v931_v55, 7  ;;  %961 = vrot.lane.b32.xlu2 %v931_v55, %s2865_s5 }
 0x2fe   : > { %v937_v58 = vsel %vm936_vm5, %v934_v56, %v935_v57  ;;  %v938_v59 = vsel %vm936_vm5, %v935_v57, %v934_v56  ;;  %v2724_v57 = vld [vmem:[%s3450_s0 + $0x8] sm:$0xff] }
 0x2ff   : > { %951 = vrot.lane.b32.xlu1 %v937_v58, %s2866_s10  ;;  %v945_v60 = vsel %vm939_vm6, %v938_v59, 0.0  ;;  %1113 = vmatpush.bf16.msra.mxu3 %v2724_v57 }
 0x300   : > { %949 = vrot.lane.b32.xlu0 %v945_v60, %s2866_s10 }
 0x34e   : > { %v960_v61 = vpop.permute.xlu2 %959 }
 0x34f   : > { %v965_v0 = vrot.slane %v960_v61, 1  ;;  %v2723_v61 = vld [vmem:[%s3450_s0] sm:$0xff]  ;;  %s3425_s0 = smov 120  }
 0x350   : > { %1114 = vmatpush.bf16.msra.mxu3 %v2723_v61 }
 0x356   : > { %v962_v63 = vpop.permute.xlu2 %961 }
 0x357   : > { %v966_v1 = vrot.slane %v962_v63, 1 }
 0x359   : > { %v968_v2 = vsel %vm967_vm7, %v965_v0, %v966_v1  ;;  %v969_v3 = vsel %vm967_vm7, %v966_v1, %v965_v0 }
 0x35a   : > { %980 = vrot.lane.b32.xlu2 %v968_v2, %s2866_s10  ;;  %v977_v4 = vsel %vm971_vm8, %v969_v3, 0.0 }
 0x35b   : > { %982 = vrot.lane.b32.xlu0 %v977_v4, %s2866_s10 }
 0x362   : > { %991 = vrot.lane.b32.xlu2 %v2775_v5, %s2866_s10  ;;  %s3455_s10 = sld [smem:[#allocation12_spill]] }
 0x371   : > { %v952_v17 = vpop.permute.xlu1 %951 }
 0x372   : > { %v950_v7 = vpop.permute.xlu0 %949  ;;  %v956_v20 = vadd.f32 %v952_v17, %v931_v55 }
 0x373   : > { %v955_v8 = vadd.f32 %v950_v7, %v929_v52 }
 0x3b4   : > { %v981_v6 = vpop.permute.xlu2 %980 }
 0x3b5   : > { %v986_v9 = vadd.f32 %v981_v6, %v955_v8 }
 0x3bc   : > { %v992_v10 = vpop.permute.xlu2 %991 }
 0x3bd   : > { %v3049_v11 = vadd.f32 %v992_v10, %v986_v9 }
 0x3bf   : > { %v3052_v12 = vmul.f32 0.70710677, %v3049_v11 }
 0x3c1   : > { %v1000_v13 = vmul.f32 %v3052_v12, %v3052_v12 }
 0x3c3   : > { %v1001_v14 = vmin.f32 %v1000_v13, 16.0 }
 0x3c5   : > { %v1013_v15 = vmul.f32 3.8918573e-05, %v1001_v14  ;;  %v1002_v21 = vmul.f32 2.1237322e-06, %v1001_v14 }
 0x3c7   : > { %v1014_v16 = vadd.f32 0.001143296, %v1013_v15  ;;  %v1003_v26 = vadd.f32 0.00028619796, %v1002_v21 }
 0x3c9   : > { %v1015_v18 = vmul.f32 %v1014_v16, %v1001_v14  ;;  %v1004_v31 = vmul.f32 %v1003_v26, %v1001_v14 }
 0x3cb   : > { %v1016_v19 = vadd.f32 0.014752088, %v1015_v18  ;;  %v1005_v36 = vadd.f32 0.0036580483, %v1004_v31  ;;  %v996_v31 = vmul.f32 0.5, %v3049_v11 }
 0x3cc   : > { %v1121_v11 = vld [vmem:[%s3451_s1] sm:$0xf] }
 0x3cd   : > { %v1017_v22 = vmul.f32 %v1016_v19, %v1001_v14  ;;  %v983_v23 = vpop.permute.xlu0 %982  ;;  %v1006_v41 = vmul.f32 %v1005_v36, %v1001_v14 }
 0x3ce   : > { %v987_v24 = vadd.f32 %v983_v23, %v956_v20 }
 0x3cf   : > { %v1018_v25 = vadd.f32 0.112945676, %v1017_v22  ;;  %v1007_v47 = vadd.f32 0.05243302, %v1006_v41 }
 0x3d0   : > { %v3056_v27 = vadd.f32 %v992_v10, %v987_v24 }
 0x3d1   : > { %v1019_v28 = vmul.f32 %v1018_v25, %v1001_v14  ;;  %v1008_v52 = vmul.f32 %v1007_v47, %v1001_v14 }
 0x3d2   : > { %v3059_v29 = vmul.f32 0.70710677, %v3056_v27 }
 0x3d3   : > { %v1020_v30 = vadd.f32 0.4994258, %v1019_v28  ;;  %v1009_v58 = vadd.f32 0.18741608, %v1008_v52 }
 0x3d4   : > { %v1040_v32 = vmul.f32 %v3059_v29, %v3059_v29 }
 0x3d5   : > { %v1021_v33 = vmul.f32 %v1020_v30, %v1001_v14  ;;  %v1010_v0 = vmul.f32 %v1009_v58, %v1001_v14 }
 0x3d6   : > { %v1041_v34 = vmin.f32 %v1040_v32, 16.0  ;;  %v997_v32 = vmul.f32 0.5, %v3056_v27 }
 0x3d7   : > { %v1022_v35 = vadd.f32 1.0, %v1021_v33  ;;  %v1011_v5 = vadd.f32 1.1283791, %v1010_v0 }
 0x3d8   : > { %v1042_v37 = vmul.f32 2.1237322e-06, %v1041_v34  ;;  %v1053_v38 = vmul.f32 3.8918573e-05, %v1041_v34 }
 0x3d9   : > { %2801 = vrcp.f32 %v1022_v35  ;;  %v1034_v2 = vand.u32 2147483648, %v1022_v35  ;;  %vm1028_vm10 = vweird.f32 %v1022_v35  ;;  %v1032_v3 = vand.u32 2147483647, %v1022_v35 }
 0x3da   : > { %v1043_v39 = vadd.f32 0.00028619796, %v1042_v37  ;;  %v1054_v40 = vadd.f32 0.001143296, %v1053_v38  ;;  %v1012_v15 = vmul.f32 %v1011_v5, %v3052_v12 }
 0x3db   : > { %v1035_v7 = vor.u32 1.1754944e-38, %v1034_v2  ;;  %vm1033_vm12 = vcmp.eq.f32.partialorder %v1032_v3, 8.507059e+37 }
 0x3dc   : > { %v1044_v42 = vmul.f32 %v1043_v39, %v1041_v34  ;;  %v1055_v43 = vmul.f32 %v1054_v40, %v1041_v34  ;;  %v2532_v40 = vld [vmem:[%s3451_s1 + $0x4] sm:$0xf] }
 0x3de   : > { %v1056_v44 = vadd.f32 0.014752088, %v1055_v43  ;;  %v1045_v46 = vadd.f32 0.0036580483, %v1044_v42  ;;  %v2535_v42 = vld [vmem:[%s3451_s1 + $0x8] sm:$0xf] }
 0x3df   : > { %v2802_v45 = vpop.eup %2801  ;;  %s3459_s1 = smov 8  }
 0x3e0   : > { %v1024_v48 = vmul.f32 %v2802_v45, %v1022_v35  ;;  %v1057_v49 = vmul.f32 %v1056_v44, %v1041_v34  ;;  %v1046_v51 = vmul.f32 %v1045_v46, %v1041_v34  ;;  %vm1029_vm9 = vweird.f32 %v2802_v45 }
 0x3e1   : > { %vm1030_vm11 = vmor %vm1028_vm10, %vm1029_vm9 }
 0x3e2   : > { %v1058_v50 = vadd.f32 0.112945676, %v1057_v49  ;;  %v1025_v53 = vsub.f32 1.0, %v1024_v48  ;;  %v1047_v56 = vadd.f32 0.05243302, %v1046_v51 }
 0x3e4   : > { %v1059_v54 = vmul.f32 %v1058_v50, %v1041_v34  ;;  %v1026_v59 = vmul.f32 %v2802_v45, %v1025_v53  ;;  %v1048_v63 = vmul.f32 %v1047_v56, %v1041_v34 }
 0x3e6   : > { %v1060_v55 = vadd.f32 0.4994258, %v1059_v54  ;;  %v1027_v1 = vadd.f32 %v2802_v45, %v1026_v59  ;;  %v1049_v4 = vadd.f32 0.18741608, %v1048_v63 }
 0x3e8   : > { %v1061_v60 = vmul.f32 %v1060_v55, %v1041_v34  ;;  %v1031_v6 = vsel %vm1030_vm11, %v2802_v45, %v1027_v1  ;;  %v1050_v10 = vmul.f32 %v1049_v4, %v1041_v34 }
 0x3e9   : > { %v1036_v9 = vsel %vm1033_vm12, %v1035_v7, %v1031_v6 }
 0x3ea   : > { %v1062_v62 = vadd.f32 1.0, %v1061_v60  ;;  %v1037_v16 = vmul.f32 %v1036_v9, %v1012_v15  ;;  %v1051_v18 = vadd.f32 1.1283791, %v1050_v10 }
 0x3ec   : > { %2803 = vrcp.f32 %v1062_v62  ;;  %v1074_v17 = vand.u32 2147483648, %v1062_v62  ;;  %v1072_v20 = vand.u32 2147483647, %v1062_v62  ;;  %vm1068_vm14 = vweird.f32 %v1062_v62 }
 0x3ed   : > { %v2521_v23 = vclamps-f32 %v1037_v16, 1.0  ;;  %v1052_v24 = vmul.f32 %v1051_v18, %v3059_v29 }
 0x3ee   : > { %v1075_v22 = vor.u32 1.1754944e-38, %v1074_v17  ;;  %vm1073_vm1 = vcmp.eq.f32.partialorder %v1072_v20, 8.507059e+37 }
 0x3ef   : > { %v1080_v30 = vadd.f32 1.0, %v2521_v23 }
 0x3f1   : > { %v1082_v34 = vmul.f32 %v1080_v30, %v996_v31 }
 0x3f2   : > { %v2804_v8 = vpop.eup %2803 }
 0x3f3   : > { %v1064_v13 = vmul.f32 %v2804_v8, %v1062_v62  ;;  %vm1069_vm13 = vweird.f32 %v2804_v8 }
 0x3f4   : > { %vm1070_vm15 = vmor %vm1068_vm14, %vm1069_vm13  ;;  %vm1612_vm13 = vcmask 195584  }
 0x3f5   : > { %v1065_v14 = vsub.f32 1.0, %v1064_v13 }
 0x3f7   : > { %v1066_v19 = vmul.f32 %v2804_v8, %v1065_v14 }
 0x3f9   : > { %v1067_v21 = vadd.f32 %v2804_v8, %v1066_v19 }
 0x3fb   : > { %v1071_v25 = vsel %vm1070_vm15, %v2804_v8, %v1067_v21 }
 0x3fc   : > { %v1076_v26 = vsel %vm1073_vm1, %v1075_v22, %v1071_v25 }
 0x3fd   : > { %v1077_v28 = vmul.f32 %v1076_v26, %v1052_v24 }
 0x3ff   : > { %v2522_v12 = vclamps-f32 %v1077_v28, 1.0 }
 0x401   : > { %v1081_v33 = vadd.f32 1.0, %v2522_v12  ;;  %v1233_v12 = vld [vmem:[%s3453_s28] sm:$0xff]  ;;  %s3427_s28 = smov 24  }
 0x403   : > { %v1083_v35 = vmul.f32 %v1081_v33, %v997_v32 }
 0x405   : > { %v1084_v36 = vpack.c.bf16 %v1083_v35, %v1082_v34  ;;  %v2868_v34 = vmov 32.0  }
 0x407   : > { %1090 = vrot.lane.b32.xlu0 %v1084_v36, %s2867_s2 }
 0x479   : > { %v1091_v37 = vpop.permute.xlu0 %1090 }
 0x47a   : > { %2531 = vmatmul.msk.bf16.vlgmr.msra.gmra.mxu3 %vm810_vm0, %v1091_v37 }
 0x4fd   : > { %v1116_v29 = vpop.f32.mrf.mxu3 }
 0x505   : > { %v1118_v38 = vpop.f32.mrf.mxu3 }
 0x506   : > { %v1122_v39 = vpack.c.bf16 %v1118_v38, %v1116_v29 }
 0x508   : > { %1164 = vrot.lane.b32.xlu0 %v1122_v39, %s2865_s5  ;;  %1126 = vrot.lane.b32.xlu2 %v1122_v39, %s2867_s2  ;;  %s3452_s2 = sld [smem:[#allocation9_spill]]  ;;  %s3457_s5 = smov 120  }
 0x509   : > { %1156 = vmatpush.bf16.msrb.mxu0 %v1122_v39 }
 0x50c   : > { %2534 = vmatmul.msk.bf16.vlgmr.msrb.gmra.mxu0 %vm1129_vm2, %v1121_v11 }
 0x50e   : > { %v2776_v48 = vld [vmem:[%s3452_s2] ss:$0 sm:$0xff]  ;;  %s3429_s2 = smov 8  }
 0x562   : > { %v1127_v27 = vpop.permute.xlu2 %1126 }
 0x563   : > { %1140 = vmatpush.bf16.msrb.mxu2 %v1127_v27 }
 0x566   : > { %2533 = vmatmul.msk.bf16.vlgmr.msrb.gmra.mxu2 %vm1129_vm2, %v2532_v40 }
 0x57a   : > { %v1165_v41 = vpop.permute.xlu0 %1164 }
 0x57b   : > { %1177 = vmatpush.bf16.msrb.mxu1 %v1165_v41 }
 0x57e   : > { %2536 = vmatmul.msk.bf16.vlgmr.msrb.gmra.mxu1 %vm1129_vm2, %v2535_v42 }
 0x589   : > { %v1158_v43 = vpop.f32.mrf.mxu0 }
 0x591   : > { %v1160_v44 = vpop.f32.mrf.mxu0 }
 0x592   : > { %v2728_v44 = vld [vmem:[%s3402_s13 + $0x8] sm:$0xff] }
 0x593   : > { %1334 = vmatpush.bf16.msra.mxu2 %v2728_v44 }
 0x5e9   : > { %v1142_v45 = vpop.f32.mrf.mxu2 }
 0x5ea   : > { %v1159_v47 = vadd.f32 %v1158_v43, %v1142_v45  ;;  %v2726_v43 = vld [vmem:[%s3400_s11 + $0x8] sm:$0xff] }
 0x5eb   : > { %v2730_v45 = vld [vmem:[%s3403_s14 + $0x8] sm:$0xff]  ;;  %1304 = vmatpush.bf16.msrb.mxu3 %v2726_v43 }
 0x5ec   : > { %1367 = vmatpush.bf16.msra.mxu0 %v2730_v45 }
 0x5f1   : > { %v1144_v46 = vpop.f32.mrf.mxu2 }
 0x5f2   : > { %v2725_v46 = vld [vmem:[%s3400_s11] sm:$0xff] }
 0x5f3   : > { %1305 = vmatpush.bf16.msrb.mxu3 %v2725_v46 }
 0x5fb   : > { %v1179_v49 = vpop.f32.mrf.mxu1 }
 0x5fc   : > { %v1183_v50 = vadd.f32 %v1179_v49, %v1159_v47  ;;  %v2727_v47 = vld [vmem:[%s3402_s13] sm:$0xff] }
 0x5fd   : > { %1335 = vmatpush.bf16.msra.mxu2 %v2727_v47 }
 0x5fe   : > { %v1188_v51 = vadd.f32 %v2776_v48, %v1183_v50  ;;  %v2729_v48 = vld [vmem:[%s3403_s14] sm:$0xff] }
 0x5ff   : > { %1368 = vmatpush.bf16.msra.mxu0 %v2729_v48 }
 0x600   : > { %v1190_v52 = vmul.f32 0.70710677, %v1188_v51  ;;  %v1189_v28 = vmul.f32 0.5, %v1188_v51 }
 0x602   : > { %v1191_v53 = vmul.f32 %v1190_v52, %v1190_v52 }
 0x603   : > { %v1181_v54 = vpop.f32.mrf.mxu1 }
 0x604   : > { %v1192_v55 = vmin.f32 %v1191_v53, 16.0 }
 0x606   : > { %v1193_v56 = vmul.f32 2.1237322e-06, %v1192_v55  ;;  %v1204_v57 = vmul.f32 3.8918573e-05, %v1192_v55 }
 0x608   : > { %v1194_v58 = vadd.f32 0.00028619796, %v1193_v56  ;;  %v1205_v59 = vadd.f32 0.001143296, %v1204_v57 }
 0x60a   : > { %v1195_v60 = vmul.f32 %v1194_v58, %v1192_v55  ;;  %v1206_v61 = vmul.f32 %v1205_v59, %v1192_v55  ;;  %v2777_v58 = vld [vmem:[%s3454_s9] ss:$0 sm:$0xff] }
 0x60c   : > { %v1207_v62 = vadd.f32 0.014752088, %v1206_v61  ;;  %v1196_v63 = vadd.f32 0.0036580483, %v1195_v60  ;;  %v2778_v61 = vld [vmem:[%s3455_s10] ss:$0 sm:$0xff] }
 0x60e   : > { %v1208_v0 = vmul.f32 %v1207_v62, %v1192_v55  ;;  %v1197_v2 = vmul.f32 %v1196_v63, %v1192_v55 }
 0x610   : > { %v1209_v1 = vadd.f32 0.112945676, %v1208_v0  ;;  %v1198_v5 = vadd.f32 0.05243302, %v1197_v2 }
 0x612   : > { %v1210_v3 = vmul.f32 %v1209_v1, %v1192_v55  ;;  %v1199_v8 = vmul.f32 %v1198_v5, %v1192_v55  ;;  %v2779_v1 = vld [vmem:[%s3404_s15] ss:$0 sm:$0xff] }
 0x614   : > { %v1211_v4 = vadd.f32 0.4994258, %v1210_v3  ;;  %v1200_v9 = vadd.f32 0.18741608, %v1199_v8 }
 0x616   : > { %v1212_v6 = vmul.f32 %v1211_v4, %v1192_v55  ;;  %v1201_v13 = vmul.f32 %v1200_v9, %v1192_v55  ;;  %v2780_v4 = vld [vmem:[%s3401_s12] ss:$0 sm:$0xff] }
 0x618   : > { %v1213_v7 = vadd.f32 1.0, %v1212_v6  ;;  %v1202_v17 = vadd.f32 1.1283791, %v1201_v13 }
 0x61a   : > { %2805 = vrcp.f32 %v1213_v7  ;;  %v1225_v16 = vand.u32 2147483648, %v1213_v7  ;;  %v1223_v19 = vand.u32 2147483647, %v1213_v7  ;;  %vm1219_vm6 = vweird.f32 %v1213_v7 }
 0x61b   : > { %v1203_v22 = vmul.f32 %v1202_v17, %v1190_v52  ;;  %2807 = vrcp.f32 %v2868_v34 }
 0x61c   : > { %v1226_v21 = vor.u32 1.1754944e-38, %v1225_v16  ;;  %vm1224_vm8 = vcmp.eq.f32.partialorder %v1223_v19, 8.507059e+37 }
 0x620   : > { %v2806_v10 = vpop.eup %2805 }
 0x621   : > { %v1215_v15 = vmul.f32 %v2806_v10, %v1213_v7  ;;  %vm1220_vm5 = vweird.f32 %v2806_v10  ;;  %v2808_v35 = vpop.eup %2807 }
 0x622   : > { %vm1221_vm7 = vmor %vm1219_vm6, %vm1220_vm5  ;;  %v1241_v36 = vmul.f32 32.0, %v2808_v35  ;;  %vm1245_vm9 = vweird.f32 %v2808_v35 }
 0x623   : > { %v1216_v14 = vsub.f32 1.0, %v1215_v15 }
 0x624   : > { %v1242_v37 = vsub.f32 1.0, %v1241_v36 }
 0x625   : > { %v1217_v18 = vmul.f32 %v2806_v10, %v1216_v14 }
 0x626   : > { %v1243_v29 = vmul.f32 %v2808_v35, %v1242_v37 }
 0x627   : > { %v1218_v20 = vadd.f32 %v2806_v10, %v1217_v18 }
 0x628   : > { %v1244_v38 = vadd.f32 %v2808_v35, %v1243_v29 }
 0x629   : > { %v1222_v23 = vsel %vm1221_vm7, %v2806_v10, %v1218_v20 }
 0x62a   : > { %v1227_v24 = vsel %vm1224_vm8, %v1226_v21, %v1222_v23  ;;  %v3097_v39 = vsel %vm1245_vm9, %v2808_v35, %v1244_v38  ;;  %vm1802_vm9 = vcmask 523264  }
 0x62b   : > { %v1228_v25 = vmul.f32 %v1227_v24, %v1203_v22 }
 0x62d   : > { %v2537_v26 = vclamps-f32 %v1228_v25, 1.0 }
 0x62f   : > { %v1231_v30 = vadd.f32 1.0, %v2537_v26 }
 0x631   : > { %v1232_v31 = vmul.f32 %v1231_v30, %v1189_v28 }
 0x633   : > { %v3093_v32 = vadd.f32 %v1233_v12, %v1232_v31 }
 0x635   : > { %v1237_v33 = vsel %vm810_vm0, %v3093_v32, 0.0 }
 0x636   : > { %1238 = vadd.xlane.f32.xlu2 %v1237_v33 }
 0x6a9   : > { %v1239_v11 = vpop.xlane.xlu2 %1238 }
 0x6aa   : > { %v1247_v27 = vmul.f32 %v3097_v39, %v1239_v11 }
 0x6ac   : > { %v1248_v40 = vsub.f32 %v3093_v32, %v1247_v27 }
 0x6ae   : > { %v1249_v41 = vmul.f32 %v1248_v40, %v1248_v40 }
 0x6b0   : > { %v1250_v42 = vsel %vm810_vm0, %v1249_v41, 0.0 }
 0x6b1   : > { %1251 = vadd.xlane.f32.xlu1 %v1250_v42 }
 0x724   : > { %v1252_v49 = vpop.xlane.xlu1 %1251 }
 0x725   : > { %v1253_v50 = vmul.f32 %v1252_v49, %v3097_v39 }
 0x727   : > { %v1254_v51 = vadd.f32 1e-05, %v1253_v50 }
 0x729   : > { %2809 = vrsqrt.f32 %v1254_v51  ;;  %vm1261_vm11 = vweird.f32 %v1254_v51 }
 0x72f   : > { %v2810_v52 = vpop.eup %2809 }
 0x730   : > { %v1256_v53 = vmul.f32 %v2810_v52, %v1254_v51  ;;  %vm1262_vm10 = vweird.f32 %v2810_v52 }
 0x731   : > { %vm1263_vm12 = vmor %vm1261_vm11, %vm1262_vm10 }
 0x732   : > { %v1257_v54 = vmul.f32 %v2810_v52, %v1256_v53 }
 0x734   : > { %v1258_v55 = vmul.f32 0.5, %v1257_v54 }
 0x736   : > { %v1259_v56 = vsub.f32 1.5, %v1258_v55 }
 0x738   : > { %v1260_v57 = vmul.f32 %v2810_v52, %v1259_v56 }
 0x73a   : > { %v1264_v59 = vsel %vm1263_vm12, %v2810_v52, %v1260_v57 }
 0x73b   : > { %v1265_v60 = vmul.f32 %v1264_v59, %v1248_v40 }
 0x73d   : > { %v1269_v62 = vmul.f32 %v2777_v58, %v1265_v60 }
 0x73f   : > { %v1273_v63 = vadd.f32 %v2778_v61, %v1269_v62 }
 0x741   : > { %v1274_v0 = vpack.c.bf16 %v1273_v63, %v1273_v63 }
 0x743   : > { %2546 = vmatmul.msk.bf16.vlgmr.msrb.gmra.mxu3 %vm810_vm0, %v1274_v0  ;;  %2555 = vmatmul.msk.bf16.vlgmr.msra.gmra.mxu2 %vm810_vm0, %v1274_v0 }
 0x744   : > { %2564 = vmatmul.msk.bf16.vlgmr.msra.gmra.mxu0 %vm810_vm0, %v1274_v0 }
 0x7c1   : > { %v1370_v2 = vpop.f32.mrf.mxu0 }
 0x7c2   : > { %v1371_v3 = vadd.f32 %v2779_v1, %v1370_v2 }
 0x7c4   : > { %v3136_v5 = vpack.c.bf16 %v1371_v3, %v1371_v3 }
 0x7c6   : > { %v1307_v6 = vpop.f32.mrf.mxu3  ;;  %v1337_v7 = vpop.f32.mrf.mxu2  ;;  %v1412_v8 = vsel %vm916_vm4, %v3136_v5, 0 }
 0x7c7   : > { %v1308_v9 = vadd.f32 %v2780_v4, %v1307_v6  ;;  %v1375_v10 = vpack.c.bf16 %v1337_v7, %v1337_v7  ;;  %1421 = vmatpush.bf16.msra.mxu3 %v1412_v8 }
 0x7c9   : > { %v1311_v13 = vmul.f32 0.35355338, %v1308_v9  ;;  %v1372_v15 = vpop.f32.mrf.mxu0  ;;  %1431 = vrot.lane.b32.xlu0 %v1375_v10, %s3425_s0  ;;  %v1381_v14 = vsel %vm885_vm3, %v1375_v10, 0 }
 0x7ca   : > { %1390 = vmatpush.bf16.xpose.msra.mxu1 %v1381_v14 }
 0x7cb   : > { %v1374_v16 = vpack.c.bf16 %v1311_v13, %v1311_v13 }
 0x7cd   : > { %1542 = vrot.lane.b32.xlu2 %v1374_v16, %s3423_s29 }
 0x7ce   : > { %v1309_v17 = vpop.f32.mrf.mxu3  ;;  %v1339_v18 = vpop.f32.mrf.mxu2 }
 0x7d1   : > { %1488 = vrot.lane.b32.xlu0 %v1375_v10, %s3430_s30  ;;  %2565 = vmatmul.msk.bf16.vlgmr.msra.gmra.mxu1 %vm885_vm3, %v1374_v16 }
 0x7d9   : > { %1428 = vrot.lane.b32.xlu0 %v1374_v16, %s3425_s0 }
 0x7e1   : > { %1544 = vrot.lane.b32.xlu0 %v1375_v10, %s3423_s29 }
 0x7e9   : > { %1486 = vrot.lane.b32.xlu0 %v1374_v16, %s3430_s30 }
 0x827   : > { %v1543_v12 = vpop.permute.xlu2 %1542 }
 0x83b   : > { %v1432_v19 = vpop.permute.xlu0 %1431 }
 0x83c   : > { %v1437_v20 = vsel %vm885_vm3, %v1432_v19, 0 }
 0x83d   : > { %1446 = vmatpush.bf16.xpose.msrb.mxu2 %v1437_v20 }
 0x843   : > { %v1489_v21 = vpop.permute.xlu0 %1488 }
 0x844   : > { %v1494_v22 = vsel %vm885_vm3, %v1489_v21, 0 }
 0x845   : > { %1503 = vmatpush.bf16.xpose.msrb.mxu1 %v1494_v22 }
 0x84b   : > { %v1429_v23 = vpop.permute.xlu0 %1428 }
 0x84c   : > { %2567 = vmatmul.msk.bf16.vlgmr.msrb.gmra.mxu2 %vm885_vm3, %v1429_v23 }
 0x84e   : > { %v1392_v24 = vpop.f32.mrf.mxu1 }
 0x84f   : > { %v1396_v25 = vsel %vm885_vm3, %v1392_v24, -inf }
 0x850   : > { %1397 = vmax.xlane.f32.xlu1 %v1396_v25 }
 0x853   : > { %v1545_v26 = vpop.permute.xlu0 %1544 }
 0x854   : > { %v1550_v28 = vsel %vm885_vm3, %v1545_v26, 0 }
 0x855   : > { %1559 = vmatpush.bf16.xpose.msra.mxu2 %v1550_v28 }
 0x856   : > { %v1394_v30 = vpop.f32.mrf.mxu1 }
 0x857   : > { %v2732_v30 = vld [vmem:[%s3405_s16 + $0x8] sm:$0xff] }
 0x858   : > { %1644 = vmatpush.bf16.msra.mxu1 %v2732_v30 }
 0x85b   : > { %v1487_v31 = vpop.permute.xlu0 %1486 }
 0x85c   : > { %2569 = vmatmul.msk.bf16.vlgmr.msrb.gmra.mxu1 %vm885_vm3, %v1487_v31  ;;  %2571 = vmatmul.msk.bf16.vlgmr.msra.gmra.mxu2 %vm885_vm3, %v1543_v12  ;;  %v2731_v12 = vld [vmem:[%s3405_s16] sm:$0xff] }
 0x85d   : > { %1645 = vmatpush.bf16.msra.mxu1 %v2731_v12 }
 0x8c3   : > { %v1398_v33 = vpop.xlane.xlu1 %1397 }
 0x8c4   : > { %v1399_v34 = vsub.f32 %v1392_v24, %v1398_v33 }
 0x8c6   : > { %v1400_v35 = vmul.f32 1.442695, %v1399_v34 }
 0x8c8   : > { %2811 = vpow2.f32 %v1400_v35 }
 0x8ce   : > { %v2812_v36 = vpop.eup %2811 }
 0x8cf   : > { %v1448_v37 = vpop.f32.mrf.mxu2  ;;  %v1402_v29 = vsel %vm885_vm3, %v2812_v36, 0.0 }
 0x8d0   : > { %1403 = vadd.xlane.f32.xlu2 %v1402_v29  ;;  %v1452_v38 = vsel %vm885_vm3, %v1448_v37, -inf }
 0x8d1   : > { %1453 = vmax.xlane.f32.xlu0 %v1452_v38  ;;  %v2781_v38 = vld [vmem:[%s3406_s17] ss:$0 sm:$0xff] }
 0x8d7   : > { %v1450_v11 = vpop.f32.mrf.mxu2 }
 0x8d9   : > { %v1505_v27 = vpop.f32.mrf.mxu1 }
 0x8da   : > { %v1509_v40 = vsel %vm885_vm3, %v1505_v27, -inf }
 0x8db   : > { %1510 = vmax.xlane.f32.xlu1 %v1509_v40 }
 0x8df   : > { %v1561_v41 = vpop.f32.mrf.mxu2 }
 0x8e0   : > { %v1565_v43 = vsel %vm885_vm3, %v1561_v41, -inf }
 0x8e1   : > { %v1507_v42 = vpop.f32.mrf.mxu1 }
 0x8e3   : > { %1566 = vmax.xlane.f32.xlu1 %v1565_v43 }
 0x8e7   : > { %v1563_v44 = vpop.f32.mrf.mxu2 }
 0x8fc   : > { %1465 = vrot.lane.b32.xlu1 %v3136_v5, %s3425_s0 }
 0x943   : > { %v1404_v45 = vpop.xlane.xlu2 %1403 }
 0x944   : > { %2813 = vrcp.f32 %v1404_v45  ;;  %v1454_v46 = vpop.xlane.xlu0 %1453 }
 0x945   : > { %v1455_v47 = vsub.f32 %v1448_v37, %v1454_v46 }
 0x947   : > { %v1456_v48 = vmul.f32 1.442695, %v1455_v47 }
 0x949   : > { %2815 = vpow2.f32 %v1456_v48  ;;  %v2734_v48 = vld [vmem:[%s3409_s20 + $0x8] sm:$0xff] }
 0x94a   : > { %v2814_v49 = vpop.eup %2813 }
 0x94b   : > { %v1406_v50 = vmul.f32 %v2814_v49, %v2812_v36 }
 0x94d   : > { %v1407_v51 = vpack.c.bf16 %v1406_v50, %v1406_v50 }
 0x94e   : > { %v1511_v52 = vpop.xlane.xlu1 %1510 }
 0x94f   : > { %v2816_v53 = vpop.eup %2815  ;;  %v1512_v54 = vsub.f32 %v1505_v27, %v1511_v52  ;;  %2566 = vmatmul.msk.bf16.vlgmr.msra.gmra.mxu3 %vm885_vm3, %v1407_v51 }
 0x950   : > { %v1458_v55 = vsel %vm885_vm3, %v2816_v53, 0.0 }
 0x951   : > { %v1513_v56 = vmul.f32 1.442695, %v1512_v54  ;;  %1459 = vadd.xlane.f32.xlu1 %v1458_v55 }
 0x953   : > { %2817 = vpow2.f32 %v1513_v56 }
 0x956   : > { %v1567_v57 = vpop.xlane.xlu1 %1566 }
 0x957   : > { %v1568_v58 = vsub.f32 %v1561_v41, %v1567_v57 }
 0x959   : > { %v2818_v59 = vpop.eup %2817  ;;  %v1569_v60 = vmul.f32 1.442695, %v1568_v58  ;;  %v2782_v58 = vld [vmem:[%s3407_s18] ss:$0 sm:$0xff] }
 0x95a   : > { %v1515_v61 = vsel %vm885_vm3, %v2818_v59, 0.0 }
 0x95b   : > { %2819 = vpow2.f32 %v1569_v60  ;;  %1516 = vadd.xlane.f32.xlu0 %v1515_v61  ;;  %v2783_v61 = vld [vmem:[%s3408_s19] ss:$0 sm:$0xff] }
 0x961   : > { %v2820_v62 = vpop.eup %2819 }
 0x962   : > { %v1571_v63 = vsel %vm885_vm3, %v2820_v62, 0.0 }
 0x963   : > { %1572 = vadd.xlane.f32.xlu0 %v1571_v63 }
 0x96a   : > { %1521 = vrot.lane.b32.xlu1 %v3136_v5, %s3430_s30  ;;  %s3460_s30 = smov 16  }
 0x96e   : > { %v1466_v0 = vpop.permute.xlu1 %1465 }
 0x96f   : > { %v1471_v1 = vsel %vm916_vm4, %v1466_v0, 0 }
 0x970   : > { %1480 = vmatpush.bf16.msrb.mxu0 %v1471_v1  ;;  %v2784_v1 = vld [vmem:[%s3410_s21] ss:$0 sm:$0xff] }
 0x977   : > { %1577 = vrot.lane.b32.xlu0 %v3136_v5, %s3423_s29 }
 0x9c4   : > { %v1460_v2 = vpop.xlane.xlu1 %1459 }
 0x9c5   : > { %2821 = vrcp.f32 %v1460_v2 }
 0x9cb   : > { %v2822_v3 = vpop.eup %2821 }
 0x9cc   : > { %v1462_v4 = vmul.f32 %v2822_v3, %v2816_v53 }
 0x9ce   : > { %v1463_v6 = vpack.c.bf16 %v1462_v4, %v1462_v4  ;;  %v1517_v7 = vpop.xlane.xlu0 %1516 }
 0x9cf   : > { %2823 = vrcp.f32 %v1517_v7 }
 0x9d0   : > { %2568 = vmatmul.msk.bf16.vlgmr.msrb.gmra.mxu0 %vm885_vm3, %v1463_v6 }
 0x9d2   : > { %v1423_v8 = vpop.f32.mrf.mxu3 }
 0x9d5   : > { %v2824_v9 = vpop.eup %2823 }
 0x9d6   : > { %v1519_v13 = vmul.f32 %v2824_v9, %v2818_v59  ;;  %v1573_v15 = vpop.xlane.xlu0 %1572  ;;  %v2738_v9 = vld [vmem:[%s3411_s22 + $0x18] sm:$0xff] }
 0x9d7   : > { %2825 = vrcp.f32 %v1573_v15  ;;  %1810 = vmatpush.bf16.msrb.mxu2 %v2738_v9 }
 0x9d8   : > { %v1520_v17 = vpack.c.bf16 %v1519_v13, %v1519_v13 }
 0x9da   : > { %v1425_v10 = vpop.f32.mrf.mxu3 }
 0x9dc   : > { %v1522_v14 = vpop.permute.xlu1 %1521 }
 0x9dd   : > { %v1527_v16 = vsel %vm916_vm4, %v1522_v14, 0  ;;  %v2826_v5 = vpop.eup %2825 }
 0x9de   : > { %1536 = vmatpush.bf16.msrb.mxu3 %v1527_v16  ;;  %v1575_v18 = vmul.f32 %v2826_v5, %v2820_v62  ;;  %v2737_v16 = vld [vmem:[%s3411_s22 + $0x10] sm:$0xff] }
 0x9df   : > { %1811 = vmatpush.bf16.msrb.mxu2 %v2737_v16 }
 0x9e0   : > { %v1576_v21 = vpack.c.bf16 %v1575_v18, %v1575_v18 }
 0x9e1   : > { %2570 = vmatmul.msk.bf16.vlgmr.msrb.gmra.mxu3 %vm885_vm3, %v1520_v17 }
 0x9e2   : > { %1714 = vmatpush.bf16.msra.mxu3 %v2734_v48 }
 0x9e9   : > { %v1578_v19 = vpop.permute.xlu0 %1577 }
 0x9ea   : > { %v1583_v20 = vsel %vm916_vm4, %v1578_v19, 0 }
 0x9eb   : > { %1592 = vmatpush.bf16.msra.mxu0 %v1583_v20  ;;  %v2736_v20 = vld [vmem:[%s3411_s22 + $0x8] sm:$0xff] }
 0x9ec   : > { %1812 = vmatpush.bf16.msrb.mxu2 %v2736_v20 }
 0x9ee   : > { %2572 = vmatmul.msk.bf16.vlgmr.msra.gmra.mxu0 %vm885_vm3, %v1576_v21 }
 0xa4d   : > { %v1482_v22 = vpop.f32.mrf.mxu0 }
 0xa4e   : > { %1599 = vrot.lane.b32.xlu2 %v1482_v22, %s3429_s2  ;;  %s3461_s2 = smov 24  }
 0xa55   : > { %v1484_v23 = vpop.f32.mrf.mxu0 }
 0xa64   : > { %v1538_v24 = vpop.f32.mrf.mxu3 }
 0xa65   : > { %1603 = vrot.lane.b32.xlu1 %v1538_v24, %s3428_s6  ;;  %v2735_v24 = vld [vmem:[%s3411_s22] sm:$0xff] }
 0xa66   : > { %1813 = vmatpush.bf16.msrb.mxu2 %v2735_v24 }
 0xa6b   : > { %v1594_v25 = vpop.f32.mrf.mxu0 }
 0xa6c   : > { %v1540_v26 = vpop.f32.mrf.mxu3 }
 0xa6d   : > { %1607 = vrot.lane.b32.xlu1 %v1594_v25, %s3427_s28 }
 0xa73   : > { %v1596_v28 = vpop.f32.mrf.mxu0 }
 0xaa8   : > { %v1600_v33 = vpop.permute.xlu2 %1599 }
 0xaa9   : > { %v1610_v34 = vsel %vm885_vm3, %v1423_v8, %v1600_v33 }
 0xad7   : > { %v1604_v31 = vpop.permute.xlu1 %1603 }
 0xad8   : > { %v1611_v35 = vsel %vm1129_vm2, %v1610_v34, %v1604_v31 }
 0xadf   : > { %v1608_v36 = vpop.permute.xlu1 %1607 }
 0xae0   : > { %v1613_v37 = vsel %vm1612_vm13, %v1611_v35, %v1608_v36 }
 0xae1   : > { %v1614_v29 = vpack.c.bf16 %v1613_v37, %v1613_v37 }
 0xae3   : > { %2581 = vmatmul.msk.bf16.vlgmr.msra.gmra.mxu1 %vm810_vm0, %v1614_v29 }
 0xb60   : > { %v1647_v11 = vpop.f32.mrf.mxu1 }
 0xb61   : > { %v1648_v27 = vadd.f32 %v2781_v38, %v1647_v11 }
 0xb63   : > { %v3192_v40 = vadd.f32 %v1648_v27, %v3093_v32  ;;  %v2733_v32 = vld [vmem:[%s3409_s20] sm:$0xff] }
 0xb64   : > { %1715 = vmatpush.bf16.msra.mxu3 %v2733_v32 }
 0xb65   : > { %v1654_v41 = vsel %vm810_vm0, %v3192_v40, 0.0 }
 0xb66   : > { %1655 = vadd.xlane.f32.xlu1 %v1654_v41 }
 0xb68   : > { %v1649_v42 = vpop.f32.mrf.mxu1 }
 0xbd9   : > { %v1656_v43 = vpop.xlane.xlu1 %1655 }
 0xbda   : > { %v1657_v44 = vmul.f32 %v1656_v43, %v3097_v39 }
 0xbdc   : > { %v1658_v45 = vsub.f32 %v3192_v40, %v1657_v44 }
 0xbde   : > { %v1659_v46 = vmul.f32 %v1658_v45, %v1658_v45 }
 0xbe0   : > { %v1660_v47 = vsel %vm810_vm0, %v1659_v46, 0.0 }
 0xbe1   : > { %1661 = vadd.xlane.f32.xlu0 %v1660_v47 }
 0xc54   : > { %v1662_v49 = vpop.xlane.xlu0 %1661 }
 0xc55   : > { %v1663_v50 = vmul.f32 %v1662_v49, %v3097_v39 }
 0xc57   : > { %v1664_v51 = vadd.f32 1e-05, %v1663_v50 }
 0xc59   : > { %2827 = vrsqrt.f32 %v1664_v51  ;;  %vm1671_vm15 = vweird.f32 %v1664_v51 }
 0xc5f   : > { %v2828_v52 = vpop.eup %2827 }
 0xc60   : > { %v1666_v53 = vmul.f32 %v2828_v52, %v1664_v51  ;;  %vm1672_vm14 = vweird.f32 %v2828_v52  ;;  %v2785_v51 = vld [vmem:[%s3412_s23] ss:$0 sm:$0xff] }
 0xc61   : > { %vm1673_vm1 = vmor %vm1671_vm15, %vm1672_vm14 }
 0xc62   : > { %v1667_v54 = vmul.f32 %v2828_v52, %v1666_v53 }
 0xc64   : > { %v1668_v55 = vmul.f32 0.5, %v1667_v54 }
 0xc66   : > { %v1669_v56 = vsub.f32 1.5, %v1668_v55 }
 0xc68   : > { %v1670_v57 = vmul.f32 %v2828_v52, %v1669_v56 }
 0xc6a   : > { %v1674_v59 = vsel %vm1673_vm1, %v2828_v52, %v1670_v57 }
 0xc6b   : > { %v1675_v60 = vmul.f32 %v1674_v59, %v1658_v45 }
 0xc6d   : > { %v1679_v62 = vmul.f32 %v2782_v58, %v1675_v60 }
 0xc6f   : > { %v1683_v63 = vadd.f32 %v2783_v61, %v1679_v62  ;;  %v2740_v62 = vld [vmem:[%s3400_s11 + $0x18] sm:$0xff] }
 0xc70   : > { %1886 = vmatpush.bf16.msrb.mxu0 %v2740_v62 }
 0xc71   : > { %v1684_v0 = vpack.c.bf16 %v1683_v63, %v1683_v63  ;;  %v2744_v63 = vld [vmem:[%s3403_s14 + $0x18] sm:$0xff] }
 0xc72   : > { %1952 = vmatpush.bf16.msrb.mxu3 %v2744_v63 }
 0xc73   : > { %2590 = vmatmul.msk.bf16.vlgmr.msra.gmra.mxu3 %vm810_vm0, %v1684_v0  ;;  %v2739_v0 = vld [vmem:[%s3400_s11 + $0x10] sm:$0xff] }
 0xc74   : > { %1887 = vmatpush.bf16.msrb.mxu0 %v2739_v0 }
 0xcf6   : > { %v1717_v2 = vpop.f32.mrf.mxu3 }
 0xcf7   : > { %v1718_v3 = vadd.f32 %v2784_v1, %v1717_v2  ;;  %v2741_v1 = vld [vmem:[%s3402_s13 + $0x10] sm:$0xff] }
 0xcf8   : > { %v2743_v2 = vld [vmem:[%s3403_s14 + $0x10] sm:$0xff] }
 0xcf9   : > { %v1722_v4 = vmul.f32 0.70710677, %v1718_v3  ;;  %v1721_v48 = vmul.f32 0.5, %v1718_v3  ;;  %1953 = vmatpush.bf16.msrb.mxu3 %v2743_v2 }
 0xcfb   : > { %v1723_v6 = vmul.f32 %v1722_v4, %v1722_v4 }
 0xcfd   : > { %v1724_v7 = vmin.f32 %v1723_v6, 16.0 }
 0xcfe   : > { %v1719_v8 = vpop.f32.mrf.mxu3 }
 0xcff   : > { %v1725_v10 = vmul.f32 2.1237322e-06, %v1724_v7  ;;  %v1736_v13 = vmul.f32 3.8918573e-05, %v1724_v7 }
 0xd01   : > { %v1726_v15 = vadd.f32 0.00028619796, %v1725_v10  ;;  %v1737_v14 = vadd.f32 0.001143296, %v1736_v13 }
 0xd03   : > { %v1727_v17 = vmul.f32 %v1726_v15, %v1724_v7  ;;  %v1738_v5 = vmul.f32 %v1737_v14, %v1724_v7  ;;  %v2786_v14 = vld [vmem:[%s3454_s9 + $0x1] ss:$0 sm:$0xff] }
 0xd05   : > { %v1739_v18 = vadd.f32 0.014752088, %v1738_v5  ;;  %v1728_v19 = vadd.f32 0.0036580483, %v1727_v17  ;;  %v2787_v5 = vld [vmem:[%s3455_s10 + $0x1] ss:$0 sm:$0xff] }
 0xd07   : > { %v1740_v21 = vmul.f32 %v1739_v18, %v1724_v7  ;;  %v1729_v23 = vmul.f32 %v1728_v19, %v1724_v7 }
 0xd09   : > { %v1741_v22 = vadd.f32 0.112945676, %v1740_v21  ;;  %v1730_v28 = vadd.f32 0.05243302, %v1729_v23  ;;  %v2788_v21 = vld [vmem:[%s3401_s12 + $0x1] ss:$0 sm:$0xff] }
 0xd0b   : > { %v1742_v25 = vmul.f32 %v1741_v22, %v1724_v7  ;;  %v1731_v31 = vmul.f32 %v1730_v28, %v1724_v7 }
 0xd0d   : > { %v1743_v26 = vadd.f32 0.4994258, %v1742_v25  ;;  %v1732_v33 = vadd.f32 0.18741608, %v1731_v31 }
 0xd0f   : > { %v1744_v30 = vmul.f32 %v1743_v26, %v1724_v7  ;;  %v1733_v35 = vmul.f32 %v1732_v33, %v1724_v7 }
 0xd11   : > { %v1745_v12 = vadd.f32 1.0, %v1744_v30  ;;  %v1734_v38 = vadd.f32 1.1283791, %v1733_v35  ;;  %v2789_v30 = vld [vmem:[%s3404_s15 + $0x1] ss:$0 sm:$0xff] }
 0xd13   : > { %2829 = vrcp.f32 %v1745_v12  ;;  %v1757_v29 = vand.u32 2147483648, %v1745_v12  ;;  %v1755_v27 = vand.u32 2147483647, %v1745_v12  ;;  %vm1751_vm6 = vweird.f32 %v1745_v12 }
 0xd14   : > { %v1735_v43 = vmul.f32 %v1734_v38, %v1722_v4 }
 0xd15   : > { %v1758_v42 = vor.u32 1.1754944e-38, %v1757_v29  ;;  %vm1756_vm8 = vcmp.eq.f32.partialorder %v1755_v27, 8.507059e+37 }
 0xd19   : > { %v2830_v34 = vpop.eup %2829 }
 0xd1a   : > { %v1747_v36 = vmul.f32 %v2830_v34, %v1745_v12  ;;  %vm1752_vm5 = vweird.f32 %v2830_v34 }
 0xd1b   : > { %vm1753_vm7 = vmor %vm1751_vm6, %vm1752_vm5 }
 0xd1c   : > { %v1748_v37 = vsub.f32 1.0, %v1747_v36 }
 0xd1e   : > { %v1749_v11 = vmul.f32 %v2830_v34, %v1748_v37 }
 0xd20   : > { %v1750_v41 = vadd.f32 %v2830_v34, %v1749_v11 }
 0xd22   : > { %v1754_v44 = vsel %vm1753_vm7, %v2830_v34, %v1750_v41 }
 0xd23   : > { %v1759_v45 = vsel %vm1756_vm8, %v1758_v42, %v1754_v44 }
 0xd24   : > { %v1760_v46 = vmul.f32 %v1759_v45, %v1735_v43 }
 0xd26   : > { %v2591_v47 = vclamps-f32 %v1760_v46, 1.0 }
 0xd28   : > { %v1763_v32 = vadd.f32 1.0, %v2591_v47 }
 0xd2a   : > { %v1764_v49 = vmul.f32 %v1763_v32, %v1721_v48 }
 0xd2c   : > { %v1765_v50 = vpack.c.bf16 %v1764_v49, %v1764_v49 }
 0xd2e   : > { %2608 = vmatmul.msk.bf16.vlgmr.msrb.gmra.mxu2 %vm1802_vm9, %v1765_v50 }
 0xdb1   : > { %v1815_v52 = vpop.f32.mrf.mxu2 }
 0xdb2   : > { %v1816_v53 = vadd.f32 %v2785_v51, %v1815_v52 }
 0xdb4   : > { %v3233_v54 = vadd.f32 %v1816_v53, %v3192_v40  ;;  %v2742_v40 = vld [vmem:[%s3402_s13 + $0x18] sm:$0xff] }
 0xdb5   : > { %1917 = vmatpush.bf16.msrb.mxu1 %v2742_v40 }
 0xdb6   : > { %v1824_v55 = vsel %vm810_vm0, %v3233_v54, 0.0 }
 0xdb7   : > { %1825 = vadd.xlane.f32.xlu2 %v1824_v55 }
 0xdb9   : > { %v1817_v56 = vpop.f32.mrf.mxu2  ;;  %1918 = vmatpush.bf16.msrb.mxu1 %v2741_v1 }
 0xe2a   : > { %v1826_v57 = vpop.xlane.xlu2 %1825 }
 0xe2b   : > { %v1827_v58 = vmul.f32 %v1826_v57, %v3097_v39 }
 0xe2d   : > { %v1828_v59 = vsub.f32 %v3233_v54, %v1827_v58 }
 0xe2f   : > { %v1829_v60 = vmul.f32 %v1828_v59, %v1828_v59 }
 0xe31   : > { %v1830_v61 = vsel %vm810_vm0, %v1829_v60, 0.0 }
 0xe32   : > { %1831 = vadd.xlane.f32.xlu1 %v1830_v61 }
 0xea5   : > { %v1832_v3 = vpop.xlane.xlu1 %1831 }
 0xea6   : > { %v1833_v4 = vmul.f32 %v1832_v3, %v3097_v39 }
 0xea8   : > { %v1834_v6 = vadd.f32 1e-05, %v1833_v4 }
 0xeaa   : > { %2831 = vrsqrt.f32 %v1834_v6  ;;  %vm1841_vm11 = vweird.f32 %v1834_v6 }
 0xeb0   : > { %v2832_v7 = vpop.eup %2831 }
 0xeb1   : > { %v1836_v8 = vmul.f32 %v2832_v7, %v1834_v6  ;;  %vm1842_vm10 = vweird.f32 %v2832_v7 }
 0xeb2   : > { %vm1843_vm12 = vmor %vm1841_vm11, %vm1842_vm10 }
 0xeb3   : > { %v1837_v9 = vmul.f32 %v2832_v7, %v1836_v8 }
 0xeb5   : > { %v1838_v10 = vmul.f32 0.5, %v1837_v9 }
 0xeb7   : > { %v1839_v13 = vsub.f32 1.5, %v1838_v10 }
 0xeb9   : > { %v1840_v15 = vmul.f32 %v2832_v7, %v1839_v13 }
 0xebb   : > { %v1844_v16 = vsel %vm1843_vm12, %v2832_v7, %v1840_v15 }
 0xebc   : > { %v1845_v17 = vmul.f32 %v1844_v16, %v1828_v59 }
 0xebe   : > { %v1849_v18 = vmul.f32 %v2786_v14, %v1845_v17 }
 0xec0   : > { %v1853_v19 = vadd.f32 %v2787_v5, %v1849_v18 }
 0xec2   : > { %v1854_v20 = vpack.c.bf16 %v1853_v19, %v1853_v19 }
 0xec4   : > { %2624 = vmatmul.msk.bf16.vlgmr.msrb.gmra.mxu0 %vm810_vm0, %v1854_v20  ;;  %2637 = vmatmul.msk.bf16.vlgmr.msrb.gmra.mxu1 %vm810_vm0, %v1854_v20 }
 0xec5   : > { %2651 = vmatmul.msk.bf16.vlgmr.msrb.gmra.mxu3 %vm810_vm0, %v1854_v20 }
 0xf41   : > { %v1889_v22 = vpop.f32.mrf.mxu0  ;;  %v1920_v23 = vpop.f32.mrf.mxu1 }
 0xf42   : > { %v1890_v24 = vadd.f32 %v2788_v21, %v1889_v22  ;;  %v1960_v25 = vpack.c.bf16 %v1920_v23, %v1920_v23 }
 0xf44   : > { %v1893_v26 = vmul.f32 0.35355338, %v1890_v24  ;;  %2073 = vrot.lane.b32.xlu1 %v1960_v25, %s3456_s4  ;;  %2016 = vrot.lane.b32.xlu0 %v1960_v25, %s3457_s5  ;;  %v1966_v28 = vsel %vm885_vm3, %v1960_v25, 0 }
 0xf45   : > { %1975 = vmatpush.bf16.xpose.msra.mxu2 %v1966_v28 }
 0xf46   : > { %v1959_v12 = vpack.c.bf16 %v1893_v26, %v1893_v26 }
 0xf48   : > { %v1955_v31 = vpop.f32.mrf.mxu3  ;;  %2013 = vrot.lane.b32.xlu2 %v1959_v12, %s3457_s5 }
 0xf49   : > { %v1956_v33 = vadd.f32 %v2789_v30, %v1955_v31  ;;  %v1891_v34 = vpop.f32.mrf.mxu0  ;;  %v1922_v35 = vpop.f32.mrf.mxu1 }
 0xf4b   : > { %v3278_v36 = vpack.c.bf16 %v1956_v33, %v1956_v33 }
 0xf4c   : > { %2129 = vrot.lane.b32.xlu0 %v1960_v25, %s3458_s7  ;;  %2652 = vmatmul.msk.bf16.vlgmr.msra.gmra.mxu2 %vm885_vm3, %v1959_v12 }
 0xf4d   : > { %v1997_v37 = vsel %vm916_vm4, %v3278_v36, 0 }
 0xf4e   : > { %2006 = vmatpush.bf16.msra.mxu0 %v1997_v37 }
 0xf50   : > { %v1957_v29 = vpop.f32.mrf.mxu3  ;;  %2071 = vrot.lane.b32.xlu2 %v1959_v12, %s3456_s4 }
 0xf54   : > { %2127 = vrot.lane.b32.xlu0 %v1959_v12, %s3458_s7 }
 0xfa2   : > { %v2014_v38 = vpop.permute.xlu2 %2013 }
 0xfaa   : > { %v2072_v43 = vpop.permute.xlu2 %2071 }
 0xfb6   : > { %v2074_v11 = vpop.permute.xlu1 %2073  ;;  %v2017_v27 = vpop.permute.xlu0 %2016 }
 0xfb7   : > { %v2079_v41 = vsel %vm885_vm3, %v2074_v11, 0  ;;  %v2022_v42 = vsel %vm885_vm3, %v2017_v27, 0 }
 0xfb8   : > { %2031 = vmatpush.bf16.xpose.msra.mxu1 %v2022_v42  ;;  %2088 = vmatpush.bf16.xpose.msrb.mxu2 %v2079_v41 }
 0xfbe   : > { %v2130_v44 = vpop.permute.xlu0 %2129 }
 0xfbf   : > { %v2135_v45 = vsel %vm885_vm3, %v2130_v44, 0  ;;  %2654 = vmatmul.msk.bf16.vlgmr.msra.gmra.mxu1 %vm885_vm3, %v2014_v38  ;;  %2656 = vmatmul.msk.bf16.vlgmr.msrb.gmra.mxu2 %vm885_vm3, %v2072_v43 }
 0xfc0   : > { %2144 = vmatpush.bf16.xpose.msrb.mxu1 %v2135_v45 }
 0xfc6   : > { %v2128_v46 = vpop.permute.xlu0 %2127 }
 0xfcf   : > { %v1977_v47 = vpop.f32.mrf.mxu2  ;;  %2658 = vmatmul.msk.bf16.vlgmr.msrb.gmra.mxu1 %vm885_vm3, %v2128_v46 }
 0xfd0   : > { %v1981_v48 = vsel %vm885_vm3, %v1977_v47, -inf }
 0xfd1   : > { %1982 = vmax.xlane.f32.xlu2 %v1981_v48  ;;  %v2745_v48 = vld [vmem:[%s3405_s16 + $0x10] sm:$0xff] }
 0xfd7   : > { %v1979_v32 = vpop.f32.mrf.mxu2 }
0x103c   : > { %v2033_v49 = vpop.f32.mrf.mxu1 }
0x103d   : > { %v2037_v50 = vsel %vm885_vm3, %v2033_v49, -inf }
0x103e   : > { %2038 = vmax.xlane.f32.xlu1 %v2037_v50 }
0x1042   : > { %v2090_v51 = vpop.f32.mrf.mxu2 }
0x1043   : > { %v2094_v56 = vsel %vm885_vm3, %v2090_v51, -inf }
0x1044   : > { %v2035_v52 = vpop.f32.mrf.mxu1  ;;  %v1983_v53 = vpop.xlane.xlu2 %1982 }
0x1045   : > { %v1984_v55 = vsub.f32 %v1977_v47, %v1983_v53  ;;  %v2746_v47 = vld [vmem:[%s3405_s16 + $0x18] sm:$0xff] }
0x1046   : > { %2095 = vmax.xlane.f32.xlu1 %v2094_v56  ;;  %2230 = vmatpush.bf16.msra.mxu2 %v2746_v47  ;;  %v2790_v56 = vld [vmem:[%s3406_s17 + $0x1] ss:$0 sm:$0xff] }
0x1047   : > { %v1985_v57 = vmul.f32 1.442695, %v1984_v55 }
0x1049   : > { %2833 = vpow2.f32 %v1985_v57 }
0x104a   : > { %v2092_v58 = vpop.f32.mrf.mxu2  ;;  %2231 = vmatpush.bf16.msra.mxu2 %v2745_v48 }
0x104c   : > { %v2146_v59 = vpop.f32.mrf.mxu1 }
0x104d   : > { %v2150_v60 = vsel %vm885_vm3, %v2146_v59, -inf }
0x104e   : > { %2151 = vmax.xlane.f32.xlu0 %v2150_v60 }
0x104f   : > { %v2834_v61 = vpop.eup %2833 }
0x1050   : > { %v1987_v40 = vsel %vm885_vm3, %v2834_v61, 0.0 }
0x1054   : > { %v2148_v62 = vpop.f32.mrf.mxu1 }
0x1056   : > { %1988 = vadd.xlane.f32.xlu0 %v1987_v40 }
0x105f   : > { %2050 = vrot.lane.b32.xlu1 %v3278_v36, %s3457_s5 }
0x10b1   : > { %v2039_v63 = vpop.xlane.xlu1 %2038 }
0x10b2   : > { %v2040_v0 = vsub.f32 %v2033_v49, %v2039_v63 }
0x10b4   : > { %v2041_v1 = vmul.f32 1.442695, %v2040_v0 }
0x10b6   : > { %2835 = vpow2.f32 %v2041_v1 }
0x10b9   : > { %v2096_v2 = vpop.xlane.xlu1 %2095 }
0x10ba   : > { %v2097_v3 = vsub.f32 %v2090_v51, %v2096_v2  ;;  %v2748_v2 = vld [vmem:[%s3409_s20 + $0x18] sm:$0xff] }
0x10bc   : > { %v2836_v4 = vpop.eup %2835  ;;  %v2098_v6 = vmul.f32 1.442695, %v2097_v3 }
0x10bd   : > { %v2043_v7 = vsel %vm885_vm3, %v2836_v4, 0.0 }
0x10be   : > { %2837 = vpow2.f32 %v2098_v6  ;;  %2044 = vadd.xlane.f32.xlu2 %v2043_v7 }
0x10c1   : > { %v2152_v8 = vpop.xlane.xlu0 %2151 }
0x10c2   : > { %v2153_v9 = vsub.f32 %v2146_v59, %v2152_v8 }
0x10c4   : > { %v2838_v10 = vpop.eup %2837  ;;  %v2154_v13 = vmul.f32 1.442695, %v2153_v9 }
0x10c5   : > { %v2100_v15 = vsel %vm885_vm3, %v2838_v10, 0.0 }
0x10c6   : > { %2839 = vpow2.f32 %v2154_v13  ;;  %2101 = vadd.xlane.f32.xlu0 %v2100_v15 }
0x10c9   : > { %v1989_v14 = vpop.xlane.xlu0 %1988 }
0x10ca   : > { %2841 = vrcp.f32 %v1989_v14  ;;  %v2791_v14 = vld [vmem:[%s3407_s18 + $0x1] ss:$0 sm:$0xff] }
0x10cc   : > { %v2840_v16 = vpop.eup %2839 }
0x10cd   : > { %v2156_v17 = vsel %vm885_vm3, %v2840_v16, 0.0 }
0x10ce   : > { %2157 = vadd.xlane.f32.xlu2 %v2156_v17 }
0x10d0   : > { %v2842_v5 = vpop.eup %2841 }
0x10d1   : > { %v1991_v18 = vmul.f32 %v2842_v5, %v2834_v61  ;;  %v2051_v19 = vpop.permute.xlu1 %2050  ;;  %v2792_v5 = vld [vmem:[%s3408_s19 + $0x1] ss:$0 sm:$0xff] }
0x10d2   : > { %v2056_v20 = vsel %vm916_vm4, %v2051_v19, 0 }
0x10d3   : > { %v1992_v21 = vpack.c.bf16 %v1991_v18, %v1991_v18  ;;  %2065 = vmatpush.bf16.msra.mxu3 %v2056_v20 }
0x10d5   : > { %2653 = vmatmul.msk.bf16.vlgmr.msra.gmra.mxu0 %vm885_vm3, %v1992_v21  ;;  %v2793_v21 = vld [vmem:[%s3410_s21 + $0x1] ss:$0 sm:$0xff] }
0x10da   : > { %2106 = vrot.lane.b32.xlu0 %v3278_v36, %s3456_s4 }
0x10e6   : > { %2162 = vrot.lane.b32.xlu2 %v3278_v36, %s3458_s7 }
0x1131   : > { %v2045_v22 = vpop.xlane.xlu2 %2044 }
0x1132   : > { %2843 = vrcp.f32 %v2045_v22 }
0x1138   : > { %v2844_v23 = vpop.eup %2843 }
0x1139   : > { %v2047_v24 = vmul.f32 %v2844_v23, %v2836_v4  ;;  %v2102_v26 = vpop.xlane.xlu0 %2101 }
0x113a   : > { %2845 = vrcp.f32 %v2102_v26 }
0x113b   : > { %v2048_v25 = vpack.c.bf16 %v2047_v24, %v2047_v24 }
0x113d   : > { %2655 = vmatmul.msk.bf16.vlgmr.msra.gmra.mxu3 %vm885_vm3, %v2048_v25 }
0x1140   : > { %v2846_v30 = vpop.eup %2845 }
0x1141   : > { %v2158_v28 = vpop.xlane.xlu2 %2157  ;;  %v2104_v35 = vmul.f32 %v2846_v30, %v2838_v10  ;;  %v2752_v30 = vld [vmem:[%s3411_s22 + $0x38] sm:$0xff] }
0x1142   : > { %2847 = vrcp.f32 %v2158_v28  ;;  %2401 = vmatpush.bf16.msra.mxu1 %v2752_v30 }
0x1143   : > { %v2105_v38 = vpack.c.bf16 %v2104_v35, %v2104_v35  ;;  %v2751_v35 = vld [vmem:[%s3411_s22 + $0x30] sm:$0xff] }
0x1146   : > { %2402 = vmatpush.bf16.msra.mxu1 %v2751_v35 }
0x1148   : > { %v2848_v12 = vpop.eup %2847 }
0x1149   : > { %v2160_v31 = vmul.f32 %v2848_v12, %v2840_v16  ;;  %v2163_v33 = vpop.permute.xlu2 %2162 }
0x114a   : > { %v2168_v34 = vsel %vm916_vm4, %v2163_v33, 0 }
0x114b   : > { %v2161_v37 = vpack.c.bf16 %v2160_v31, %v2160_v31  ;;  %2177 = vmatpush.bf16.msrb.mxu3 %v2168_v34 }
0x114c   : > { %v2107_v36 = vpop.permute.xlu0 %2106 }
0x114d   : > { %v2112_v29 = vsel %vm916_vm4, %v2107_v36, 0 }
0x114e   : > { %2121 = vmatpush.bf16.msrb.mxu0 %v2112_v29  ;;  %2659 = vmatmul.msk.bf16.vlgmr.msrb.gmra.mxu3 %vm885_vm3, %v2161_v37 }
0x1151   : > { %2657 = vmatmul.msk.bf16.vlgmr.msrb.gmra.mxu0 %vm885_vm3, %v2105_v38 }
0x1152   : > { %v2008_v11 = vpop.f32.mrf.mxu0  ;;  %2304 = vmatpush.bf16.msra.mxu0 %v2748_v2 }
0x115a   : > { %v2010_v27 = vpop.f32.mrf.mxu0 }
0x11c0   : > { %v2067_v41 = vpop.f32.mrf.mxu3 }
0x11c1   : > { %2184 = vrot.lane.b32.xlu1 %v2067_v41, %s3459_s1 }
0x11c8   : > { %v2069_v42 = vpop.f32.mrf.mxu3 }
0x11ce   : > { %v2123_v43 = vpop.f32.mrf.mxu0 }
0x11cf   : > { %2188 = vrot.lane.b32.xlu0 %v2123_v43, %s3460_s30  ;;  %v2749_v43 = vld [vmem:[%s3411_s22 + $0x20] sm:$0xff]  ;;  %s2504_s30 = sshll.u32 %s3463_s3, 3 }
0x11d0   : > { %s789_s5 = scalar_lea.vmem %s3415_s26, %s2504_s30 }
0x11d1   : > { %v2179_v44 = vpop.f32.mrf.mxu3 }
0x11d2   : > { %2192 = vrot.lane.b32.xlu1 %v2179_v44, %s3461_s2 }
0x11d6   : > { %v2125_v45 = vpop.f32.mrf.mxu0 }
0x11d9   : > { %v2181_v46 = vpop.f32.mrf.mxu3 }
0x1233   : > { %v2185_v32 = vpop.permute.xlu1 %2184 }
0x1234   : > { %v2195_v50 = vsel %vm885_vm3, %v2008_v11, %v2185_v32  ;;  %v2750_v11 = vld [vmem:[%s3411_s22 + $0x28] sm:$0xff] }
0x1235   : > { %2403 = vmatpush.bf16.msra.mxu1 %v2750_v11 }
0x1239   : > { %2404 = vmatpush.bf16.msra.mxu1 %v2749_v43 }
0x1241   : > { %v2189_v49 = vpop.permute.xlu0 %2188 }
0x1242   : > { %v2196_v51 = vsel %vm1129_vm2, %v2195_v50, %v2189_v49 }
0x1244   : > { %v2193_v52 = vpop.permute.xlu1 %2192 }
0x1245   : > { %v2197_v53 = vsel %vm1612_vm13, %v2196_v51, %v2193_v52 }
0x1246   : > { %v2198_v55 = vpack.c.bf16 %v2197_v53, %v2197_v53 }
0x1248   : > { %2673 = vmatmul.msk.bf16.vlgmr.msra.gmra.mxu2 %vm810_vm0, %v2198_v55 }
0x12cb   : > { %v2233_v57 = vpop.f32.mrf.mxu2 }
0x12cc   : > { %v2234_v58 = vadd.f32 %v2790_v56, %v2233_v57 }
0x12ce   : > { %v3330_v59 = vadd.f32 %v2234_v58, %v3233_v54  ;;  %v2747_v54 = vld [vmem:[%s3409_s20 + $0x10] sm:$0xff] }
0x12cf   : > { %2305 = vmatpush.bf16.msra.mxu0 %v2747_v54 }
0x12d0   : > { %v2242_v60 = vsel %vm810_vm0, %v3330_v59, 0.0 }
0x12d1   : > { %2243 = vadd.xlane.f32.xlu2 %v2242_v60 }
0x12d3   : > { %v2235_v61 = vpop.f32.mrf.mxu2 }
0x1344   : > { %v2244_v62 = vpop.xlane.xlu2 %2243 }
0x1345   : > { %v2245_v40 = vmul.f32 %v2244_v62, %v3097_v39 }
0x1347   : > { %v2246_v63 = vsub.f32 %v3330_v59, %v2245_v40 }
0x1349   : > { %v2247_v0 = vmul.f32 %v2246_v63, %v2246_v63 }
0x134b   : > { %v2248_v1 = vsel %vm810_vm0, %v2247_v0, 0.0 }
0x134c   : > { %2249 = vadd.xlane.f32.xlu0 %v2248_v1 }
0x13bf   : > { %v2250_v3 = vpop.xlane.xlu0 %2249 }
0x13c0   : > { %v2251_v4 = vmul.f32 %v2250_v3, %v3097_v39 }
0x13c2   : > { %v2252_v6 = vadd.f32 1e-05, %v2251_v4 }
0x13c4   : > { %2849 = vrsqrt.f32 %v2252_v6  ;;  %vm2259_vm4 = vweird.f32 %v2252_v6 }
0x13ca   : > { %v2850_v7 = vpop.eup %2849 }
0x13cb   : > { %v2254_v8 = vmul.f32 %v2850_v7, %v2252_v6  ;;  %vm2260_vm3 = vweird.f32 %v2850_v7  ;;  %v2794_v6 = vld [vmem:[%s3412_s23 + $0x1] ss:$0 sm:$0xff] }
0x13cc   : > { %vm2261_vm2 = vmor %vm2259_vm4, %vm2260_vm3 }
0x13cd   : > { %v2255_v9 = vmul.f32 %v2850_v7, %v2254_v8 }
0x13cf   : > { %v2256_v10 = vmul.f32 0.5, %v2255_v9 }
0x13d1   : > { %v2257_v13 = vsub.f32 1.5, %v2256_v10 }
0x13d3   : > { %v2258_v15 = vmul.f32 %v2850_v7, %v2257_v13 }
0x13d5   : > { %v2262_v16 = vsel %vm2261_vm2, %v2850_v7, %v2258_v15 }
0x13d6   : > { %v2263_v17 = vmul.f32 %v2262_v16, %v2246_v63 }
0x13d8   : > { %v2267_v18 = vmul.f32 %v2791_v14, %v2263_v17 }
0x13da   : > { %v2271_v19 = vadd.f32 %v2792_v5, %v2267_v18 }
0x13dc   : > { %v2272_v20 = vpack.c.bf16 %v2271_v19, %v2271_v19 }
0x13de   : > { %2689 = vmatmul.msk.bf16.vlgmr.msra.gmra.mxu0 %vm810_vm0, %v2272_v20 }
0x145b   : > { %v2307_v22 = vpop.f32.mrf.mxu0 }
0x145c   : > { %v2308_v23 = vadd.f32 %v2793_v21, %v2307_v22 }
0x145e   : > { %v2312_v24 = vmul.f32 0.70710677, %v2308_v23  ;;  %v2311_v2 = vmul.f32 0.5, %v2308_v23 }
0x1460   : > { %v2313_v25 = vmul.f32 %v2312_v24, %v2312_v24 }
0x1462   : > { %v2314_v26 = vmin.f32 %v2313_v25, 16.0 }
0x1463   : > { %v2309_v28 = vpop.f32.mrf.mxu0 }
0x1464   : > { %v2315_v12 = vmul.f32 2.1237322e-06, %v2314_v26  ;;  %v2326_v31 = vmul.f32 3.8918573e-05, %v2314_v26 }
0x1466   : > { %v2316_v33 = vadd.f32 0.00028619796, %v2315_v12  ;;  %v2327_v34 = vadd.f32 0.001143296, %v2326_v31 }
0x1468   : > { %v2317_v37 = vmul.f32 %v2316_v33, %v2314_v26  ;;  %v2328_v36 = vmul.f32 %v2327_v34, %v2314_v26 }
0x146a   : > { %v2329_v29 = vadd.f32 0.014752088, %v2328_v36  ;;  %v2318_v38 = vadd.f32 0.0036580483, %v2317_v37 }
0x146c   : > { %v2330_v27 = vmul.f32 %v2329_v29, %v2314_v26  ;;  %v2319_v42 = vmul.f32 %v2318_v38, %v2314_v26 }
0x146e   : > { %v2331_v41 = vadd.f32 0.112945676, %v2330_v27  ;;  %v2320_v46 = vadd.f32 0.05243302, %v2319_v42 }
0x1470   : > { %v2332_v44 = vmul.f32 %v2331_v41, %v2314_v26  ;;  %v2321_v32 = vmul.f32 %v2320_v46, %v2314_v26 }
0x1472   : > { %v2333_v45 = vadd.f32 0.4994258, %v2332_v44  ;;  %v2322_v49 = vadd.f32 0.18741608, %v2321_v32 }
0x1474   : > { %v2334_v47 = vmul.f32 %v2333_v45, %v2314_v26  ;;  %v2323_v51 = vmul.f32 %v2322_v49, %v2314_v26  ;;  %v2795_v26 = vld [vmem:[%s3413_s24] ss:$0 sm:$0xff] }
0x1476   : > { %v2335_v48 = vadd.f32 1.0, %v2334_v47  ;;  %v2324_v56 = vadd.f32 1.1283791, %v2323_v51 }
0x1478   : > { %2851 = vrcp.f32 %v2335_v48  ;;  %v2347_v55 = vand.u32 2147483648, %v2335_v48  ;;  %v2345_v58 = vand.u32 2147483647, %v2335_v48  ;;  %vm2341_vm14 = vweird.f32 %v2335_v48 }
0x1479   : > { %v2325_v62 = vmul.f32 %v2324_v56, %v2312_v24 }
0x147a   : > { %v2348_v61 = vor.u32 1.1754944e-38, %v2347_v55  ;;  %vm2346_vm1 = vcmp.eq.f32.partialorder %v2345_v58, 8.507059e+37 }
0x147e   : > { %v2852_v50 = vpop.eup %2851 }
0x147f   : > { %v2337_v52 = vmul.f32 %v2852_v50, %v2335_v48  ;;  %vm2342_vm13 = vweird.f32 %v2852_v50 }
0x1480   : > { %vm2343_vm15 = vmor %vm2341_vm14, %vm2342_vm13 }
0x1481   : > { %v2338_v53 = vsub.f32 1.0, %v2337_v52 }
0x1483   : > { %v2339_v57 = vmul.f32 %v2852_v50, %v2338_v53 }
0x1485   : > { %v2340_v60 = vadd.f32 %v2852_v50, %v2339_v57 }
0x1487   : > { %v2344_v40 = vsel %vm2343_vm15, %v2852_v50, %v2340_v60 }
0x1488   : > { %v2349_v63 = vsel %vm2346_vm1, %v2348_v61, %v2344_v40 }
0x1489   : > { %v2350_v0 = vmul.f32 %v2349_v63, %v2325_v62 }
0x148b   : > { %v2690_v1 = vclamps-f32 %v2350_v0, 1.0 }
0x148d   : > { %v2353_v54 = vadd.f32 1.0, %v2690_v1 }
0x148f   : > { %v2354_v3 = vmul.f32 %v2353_v54, %v2311_v2 }
0x1491   : > { %v2355_v4 = vpack.c.bf16 %v2354_v3, %v2354_v3 }
0x1493   : > { %2716 = vmatmul.msk.bf16.vlgmr.msra.gmra.mxu1 %vm1802_vm9, %v2355_v4 }
0x1510   : > { %v2406_v7 = vpop.f32.mrf.mxu1 }
0x1511   : > { %v2407_v8 = vadd.f32 %v2794_v6, %v2406_v7 }
0x1513   : > { %v2410_v9 = vadd.f32 %v2407_v8, %v3330_v59 }
0x1515   : > { %v2413_v10 = vsel %vm810_vm0, %v2410_v9, 0.0 }
0x1516   : > { %2414 = vadd.xlane.f32.xlu1 %v2413_v10 }
0x1518   : > { %v2408_v13 = vpop.f32.mrf.mxu1 }
0x1589   : > { %v2415_v15 = vpop.xlane.xlu1 %2414 }
0x158a   : > { %v2416_v14 = vmul.f32 %v2415_v15, %v3097_v39 }
0x158c   : > { %v2417_v16 = vsub.f32 %v2410_v9, %v2416_v14 }
0x158e   : > { %v2418_v17 = vmul.f32 %v2417_v16, %v2417_v16 }
0x1590   : > { %v2419_v5 = vsel %vm810_vm0, %v2418_v17, 0.0 }
0x1591   : > { %2420 = vadd.xlane.f32.xlu2 %v2419_v5 }
0x1604   : > { %v2421_v18 = vpop.xlane.xlu2 %2420 }
0x1605   : > { %v2422_v19 = vmul.f32 %v2421_v18, %v3097_v39  ;;  %v2796_v39 = vld [vmem:[%s3414_s25] ss:$0 sm:$0xff] }
0x1607   : > { %v2423_v20 = vadd.f32 1e-05, %v2422_v19 }
0x1609   : > { %2853 = vrsqrt.f32 %v2423_v20  ;;  %vm2430_vm6 = vweird.f32 %v2423_v20 }
0x160f   : > { %v2854_v21 = vpop.eup %2853 }
0x1610   : > { %v2425_v59 = vmul.f32 %v2854_v21, %v2423_v20  ;;  %vm2431_vm5 = vweird.f32 %v2854_v21 }
0x1611   : > { %vm2432_vm7 = vmor %vm2430_vm6, %vm2431_vm5 }
0x1612   : > { %v2426_v22 = vmul.f32 %v2854_v21, %v2425_v59 }
0x1614   : > { %v2427_v23 = vmul.f32 0.5, %v2426_v22 }
0x1616   : > { %v2428_v24 = vsub.f32 1.5, %v2427_v23 }
0x1618   : > { %v2429_v25 = vmul.f32 %v2854_v21, %v2428_v24 }
0x161a   : > { %v2433_v28 = vsel %vm2432_vm7, %v2854_v21, %v2429_v25 }
0x161b   : > { %v2434_v30 = vmul.f32 %v2433_v28, %v2417_v16 }
0x161d   : > { %v2438_v12 = vmul.f32 %v2795_v26, %v2434_v30 }
0x161f   : > { %v2442_v31 = vadd.f32 %v2796_v39, %v2438_v12 }
0x1621   : > { %2443 = vst.msk [vmem:[%s789_s5] sm:$0xff] %vm810_vm0, %v2442_v31 }
0x1622 PF: > { %s36_s27 = sadd.s32 1, %s2861_s27  }
0x1623   : > { %p33_p4 = scmp.ge.s32.totalorder %s36_s27, 4  }
0x1625   :  { %35 = sbr.rel (!%p33_p4) target bundleno = 12 (0xc), region = 171 }

</bundles_post_ra>
